<compile_context>
chip_gen: v5e
topology: v5e:2x2
jax: 0.10.0
libtpu: 0.0.40
codegen_flags: <defaults>
</compile_context>

<pallas_src>
import math
import functools

import jax
import jax.numpy as jnp
from jax.experimental import pallas as pl
from jax.experimental.pallas import tpu as pltpu


# ----------------------------- helpers -----------------------------

def _round_up(x, m):
    return (x + m - 1) // m * m


def _block(dim, target, align):
    """Return (block_size, padded_dim).

    If dim <= target the whole (unpadded) dim is one block (always a legal block
    shape).  Otherwise the block is `target` (quantized to `align`) and the caller
    zero-pads the array up to a multiple of it -- no silent full-dim fallback."""
    if dim <= target:
        return dim, dim
    t = max(align, (target // align) * align)
    return t, _round_up(dim, t)


def _pad_to(a, shape):
    pads = [(0, t - s) for s, t in zip(a.shape, shape)]
    if all(p == (0, 0) for p in pads):
        return a
    return jnp.pad(a, pads)


# ----------------------------- tiled matmul (+bias, +relu, optional rhs^T) -----------------------------

def _matmul_kernel(*refs, relu, trans_rhs, has_bias):
    if has_bias:
        x_ref, w_ref, b_ref, o_ref, acc_ref = refs
    else:
        x_ref, w_ref, o_ref, acc_ref = refs
        b_ref = None

    @pl.when(pl.program_id(2) == 0)
    def _():
        acc_ref[...] = jnp.zeros_like(acc_ref)

    x = x_ref[...].astype(jnp.bfloat16)
    w = w_ref[...].astype(jnp.bfloat16)
    if trans_rhs:
        acc_ref[...] += jax.lax.dot_general(
            x, w, (((1,), (1,)), ((), ())), preferred_element_type=jnp.float32)
    else:
        acc_ref[...] += jnp.dot(x, w, preferred_element_type=jnp.float32)

    @pl.when(pl.program_id(2) == pl.num_programs(2) - 1)
    def _():
        y = acc_ref[...]
        if has_bias:
            y = y + b_ref[...]
        if relu:
            y = jnp.maximum(y, 0.0)
        o_ref[...] = y.astype(o_ref.dtype)


def matmul(x, w, b=None, *, relu=False, trans_rhs=False, out_dtype=jnp.bfloat16,
           tm_target=256, tn_target=256, tk_target=512):
    """y = x @ w (+ b).  x: (M, K).  w: (K, N), or (N, K) when trans_rhs=True.
    bf16 operands, f32 accumulation.  Ragged dims are zero-padded and sliced back."""
    M, K = x.shape
    if trans_rhs:
        N, Kw = w.shape
    else:
        Kw, N = w.shape
    assert Kw == K
    tm, Mp = _block(M, tm_target, 8)
    tn, Np = _block(N, tn_target, 128)
    tk, Kp = _block(K, tk_target, 128)

    x = _pad_to(x, (Mp, Kp))
    w = _pad_to(w, (Np, Kp) if trans_rhs else (Kp, Np))

    in_specs = [pl.BlockSpec((tm, tk), lambda i, j, k: (i, k))]
    if trans_rhs:
        in_specs.append(pl.BlockSpec((tn, tk), lambda i, j, k: (j, k)))
    else:
        in_specs.append(pl.BlockSpec((tk, tn), lambda i, j, k: (k, j)))
    args = [x, w]
    if b is not None:
        in_specs.append(pl.BlockSpec((1, tn), lambda i, j, k: (0, j)))
        args.append(_pad_to(b.reshape(1, N).astype(jnp.float32), (1, Np)))

    out = pl.pallas_call(
        functools.partial(_matmul_kernel, relu=relu, trans_rhs=trans_rhs,
                          has_bias=b is not None),
        out_shape=jax.ShapeDtypeStruct((Mp, Np), out_dtype),
        grid=(Mp // tm, Np // tn, Kp // tk),
        in_specs=in_specs,
        out_specs=pl.BlockSpec((tm, tn), lambda i, j, k: (i, j)),
        scratch_shapes=[pltpu.VMEM((tm, tn), jnp.float32)],
        compiler_params=pltpu.CompilerParams(
            dimension_semantics=("parallel", "parallel", "arbitrary")),
    )(*args)
    if Mp != M or Np != N:
        out = out[:M, :N]
    return out


# ----------------------------- fused matmul + bias + residual + LayerNorm -----------------------------

def _mm_res_ln_kernel(x_ref, w_ref, b_ref, r_ref, g_ref, be_ref, o_ref, acc_ref, *, eps):
    @pl.when(pl.program_id(1) == 0)
    def _():
        acc_ref[...] = jnp.zeros_like(acc_ref)

    acc_ref[...] += jnp.dot(x_ref[...].astype(jnp.bfloat16),
                            w_ref[...].astype(jnp.bfloat16),
                            preferred_element_type=jnp.float32)

    @pl.when(pl.program_id(1) == pl.num_programs(1) - 1)
    def _():
        y = acc_ref[...] + b_ref[...] + r_ref[...].astype(jnp.float32)
        mu = jnp.mean(y, axis=-1, keepdims=True)
        var = jnp.mean((y - mu) ** 2, axis=-1, keepdims=True)
        o_ref[...] = ((y - mu) * jax.lax.rsqrt(var + eps) * g_ref[...] + be_ref[...]
                      ).astype(o_ref.dtype)


def matmul_residual_layernorm(x, w, b, residual, gamma, beta, *, eps=1e-5,
                              tm_target=128, tk_target=512):
    """LayerNorm(x @ w + b + residual) over the last dim.  x: (M, K), w: (K, D)."""
    M, K = x.shape
    D = w.shape[1]
    tm, Mp = _block(M, tm_target, 8)
    tk, Kp = _block(K, tk_target, 128)
    x = _pad_to(x, (Mp, Kp))
    w = _pad_to(w, (Kp, D))
    residual = _pad_to(residual, (Mp, D))
    out = pl.pallas_call(
        functools.partial(_mm_res_ln_kernel, eps=eps),
        out_shape=jax.ShapeDtypeStruct((Mp, D), jnp.bfloat16),
        grid=(Mp // tm, Kp // tk),
        in_specs=[
            pl.BlockSpec((tm, tk), lambda i, k: (i, k)),
            pl.BlockSpec((tk, D), lambda i, k: (k, 0)),
            pl.BlockSpec((1, D), lambda i, k: (0, 0)),
            pl.BlockSpec((tm, D), lambda i, k: (i, 0)),
            pl.BlockSpec((1, D), lambda i, k: (0, 0)),
            pl.BlockSpec((1, D), lambda i, k: (0, 0)),
        ],
        out_specs=pl.BlockSpec((tm, D), lambda i, k: (i, 0)),
        scratch_shapes=[pltpu.VMEM((tm, D), jnp.float32)],
        compiler_params=pltpu.CompilerParams(
            dimension_semantics=("parallel", "arbitrary")),
    )(x, w, b.reshape(1, D).astype(jnp.float32), residual,
      gamma.reshape(1, D).astype(jnp.float32), beta.reshape(1, D).astype(jnp.float32))
    return out[:M] if Mp != M else out


# ----------------------------- fused FFN (H-tiled) + residual + LayerNorm -----------------------------

def _ffn_res_ln_kernel(x_ref, w1_ref, b1_ref, w2_ref, b2_ref, g_ref, be_ref,
                       o_ref, acc_ref, *, eps):
    j = pl.program_id(1)

    @pl.when(j == 0)
    def _():
        acc_ref[...] = jnp.zeros_like(acc_ref)

    x = x_ref[...]                                    # (tm, D) bf16, resident across j
    h = jnp.dot(x.astype(jnp.bfloat16), w1_ref[...].astype(jnp.bfloat16),
                preferred_element_type=jnp.float32) + b1_ref[...]
    h = jnp.maximum(h, 0.0)
    acc_ref[...] += jnp.dot(h.astype(jnp.bfloat16), w2_ref[...].astype(jnp.bfloat16),
                            preferred_element_type=jnp.float32)

    @pl.when(j == pl.num_programs(1) - 1)
    def _():
        y = acc_ref[...] + b2_ref[...] + x.astype(jnp.float32)
        mu = jnp.mean(y, axis=-1, keepdims=True)
        var = jnp.mean((y - mu) ** 2, axis=-1, keepdims=True)
        o_ref[...] = ((y - mu) * jax.lax.rsqrt(var + eps) * g_ref[...] + be_ref[...]
                      ).astype(o_ref.dtype)


def ffn_residual_layernorm(x, w1, b1, w2, b2, gamma, beta, *, eps=1e-5,
                           tm_target=128, th_target=256):
    """LayerNorm(x + W2(relu(W1 x + b1)) + b2) over the last dim, tiled over H so
    W1/W2 are streamed in th-wide slices instead of held whole in VMEM."""
    # TODO(synk): grid-invariant operands (b2/gamma/beta, and x across the H axis)
    # could be single-buffered via pipeline_mode=pl.Buffered(1) to shave a little VMEM.
    M, D = x.shape
    H = w1.shape[1]
    tm, Mp = _block(M, tm_target, 8)
    th, Hp = _block(H, th_target, 128)
    x = _pad_to(x, (Mp, D))
    w1 = _pad_to(w1, (D, Hp))
    b1 = _pad_to(b1.reshape(1, H).astype(jnp.float32), (1, Hp))
    w2 = _pad_to(w2, (Hp, D))
    out = pl.pallas_call(
        functools.partial(_ffn_res_ln_kernel, eps=eps),
        out_shape=jax.ShapeDtypeStruct((Mp, D), jnp.bfloat16),
        grid=(Mp // tm, Hp // th),
        in_specs=[
            pl.BlockSpec((tm, D), lambda i, j: (i, 0)),
            pl.BlockSpec((D, th), lambda i, j: (0, j)),
            pl.BlockSpec((1, th), lambda i, j: (0, j)),
            pl.BlockSpec((th, D), lambda i, j: (j, 0)),
            pl.BlockSpec((1, D), lambda i, j: (0, 0)),
            pl.BlockSpec((1, D), lambda i, j: (0, 0)),
            pl.BlockSpec((1, D), lambda i, j: (0, 0)),
        ],
        out_specs=pl.BlockSpec((tm, D), lambda i, j: (i, 0)),
        scratch_shapes=[pltpu.VMEM((tm, D), jnp.float32)],
        compiler_params=pltpu.CompilerParams(
            dimension_semantics=("parallel", "arbitrary")),
    )(x, w1, b1, w2, b2.reshape(1, D).astype(jnp.float32),
      gamma.reshape(1, D).astype(jnp.float32), beta.reshape(1, D).astype(jnp.float32))
    return out[:M] if Mp != M else out


# ----------------------------- flash-style multi-head attention -----------------------------

_NEG_BIG = -1e30   # running-max init (never produced by scores; masked fill is -1e9)


def _flash_attn_kernel(km_ref, q_ref, k_ref, v_ref, o_ref, m_sc, l_sc, acc_sc,
                       *, causal, tq, tk):
    qi = pl.program_id(2)
    ki = pl.program_id(3)

    @pl.when(ki == 0)
    def _():
        m_sc[...] = jnp.full(m_sc.shape, _NEG_BIG, jnp.float32)
        l_sc[...] = jnp.zeros_like(l_sc)
        acc_sc[...] = jnp.zeros_like(acc_sc)

    # scores: q is pre-scaled by 1/sqrt(hd) in the wrapper
    s = jax.lax.dot_general(q_ref[...], k_ref[...], (((1,), (1,)), ((), ())),
                            preferred_element_type=jnp.float32)          # (tq, tk)

    keep = km_ref[...] > 0.5                                             # (1, tk)
    if causal:
        row = qi * tq + jax.lax.broadcasted_iota(jnp.int32, (tq, tk), 0)
        col = ki * tk + jax.lax.broadcasted_iota(jnp.int32, (tq, tk), 1)
        keep = jnp.logical_and(keep, col <= row)
    s = jnp.where(keep, s, -1e9)

    m_prev = m_sc[...]
    m_new = jnp.maximum(m_prev, jnp.max(s, axis=-1, keepdims=True))
    alpha = jnp.exp(m_prev - m_new)
    p = jnp.exp(s - m_new)
    l_sc[...] = alpha * l_sc[...] + jnp.sum(p, axis=-1, keepdims=True)
    acc_sc[...] = alpha * acc_sc[...] + jnp.dot(p.astype(v_ref.dtype), v_ref[...],
                                                preferred_element_type=jnp.float32)
    m_sc[...] = m_new

    @pl.when(ki == pl.num_programs(3) - 1)
    def _():
        o_ref[...] = (acc_sc[...] * pl.reciprocal(l_sc[...], approx=True)
                      ).astype(o_ref.dtype)


def fused_attention(q, k, v, key_mask, *, n_heads, causal,
                    tq_target=128, tk_target=256):
    """q: (B, Sq, D), k/v: (B, Sk, D), key_mask: (B, Sk) with 1 = attend, 0 = masked.
    Returns (B, Sq, D) bf16.  Flash-style: online softmax over kv tiles, grid
    (B, head, q_tile, kv_tile), mask built in-kernel from iota + key padding."""
    B, Sq, D = q.shape
    Sk = k.shape[1]
    hd = D // n_heads
    scale = 1.0 / math.sqrt(hd)

    tq, Sqp = _block(Sq, tq_target, 8)
    tk, Skp = _block(Sk, tk_target, 128)

    def to_heads(a, s_len, s_pad):
        a = a.reshape(B, s_len, n_heads, hd).transpose(0, 2, 1, 3)   # (B, H, S, hd)
        if s_pad != s_len:
            a = jnp.pad(a, ((0, 0), (0, 0), (0, s_pad - s_len), (0, 0)))
        return a.astype(jnp.bfloat16)

    # TODO(synk): for hd < 128 the per-head lanes are under-filled; a head-group
    # packing (batched dot over a heads axis) would widen DMAs/stores further.
    qh = to_heads(q * scale, Sq, Sqp)      # fold 1/sqrt(hd) into q (fused with transpose)
    kh = to_heads(k, Sk, Skp)
    vh = to_heads(v, Sk, Skp)
    km = key_mask.astype(jnp.float32).reshape(B, 1, Sk)
    if Skp != Sk:
        km = jnp.pad(km, ((0, 0), (0, 0), (0, Skp - Sk)))   # padded keys are masked out

    out = pl.pallas_call(
        functools.partial(_flash_attn_kernel, causal=causal, tq=tq, tk=tk),
        out_shape=jax.ShapeDtypeStruct((B, n_heads, Sqp, hd), jnp.bfloat16),
        grid=(B, n_heads, Sqp // tq, Skp // tk),
        in_specs=[
            pl.BlockSpec((None, 1, tk), lambda b, h, qi, ki: (b, 0, ki)),
            pl.BlockSpec((None, None, tq, hd), lambda b, h, qi, ki: (b, h, qi, 0)),
            pl.BlockSpec((None, None, tk, hd), lambda b, h, qi, ki: (b, h, ki, 0)),
            pl.BlockSpec((None, None, tk, hd), lambda b, h, qi, ki: (b, h, ki, 0)),
        ],
        out_specs=pl.BlockSpec((None, None, tq, hd),
                               lambda b, h, qi, ki: (b, h, qi, 0)),
        scratch_shapes=[pltpu.VMEM((tq, 1), jnp.float32),
                        pltpu.VMEM((tq, 1), jnp.float32),
                        pltpu.VMEM((tq, hd), jnp.float32)],
        compiler_params=pltpu.CompilerParams(
            dimension_semantics=("parallel", "parallel", "parallel", "arbitrary")),
    )(km, qh, kh, vh)

    out = out[:, :, :Sq, :].transpose(0, 2, 1, 3).reshape(B, Sq, D)
    return out


# ----------------------------- model glue (plain JAX between fused kernels) -----------------------------

def encoder_layer(p, x, enc_key_mask, n_heads):
    B, S, D = x.shape
    x2 = x.reshape(B * S, D)
    qkv = matmul(x2, p["wqkv"], p["bqkv"]).reshape(B, S, 3 * D)
    q, k, v = qkv[..., :D], qkv[..., D:2 * D], qkv[..., 2 * D:]
    attn = fused_attention(q, k, v, enc_key_mask, n_heads=n_heads, causal=False)
    out = matmul_residual_layernorm(attn.reshape(B * S, D), p["wo"], p["bo"],
                                    x2, p["g1"], p["be1"])
    out = ffn_residual_layernorm(out, p["w1"], p["bf1"], p["w2"], p["bf2"],
                                 p["g2"], p["be2"])
    return out.reshape(B, S, D)


def decoder_layer(p, x, enc_out, enc_key_mask, dec_key_mask, n_heads):
    B, St, D = x.shape
    Ss = enc_out.shape[1]
    x2 = x.reshape(B * St, D)
    enc2 = enc_out.reshape(B * Ss, D)

    # masked self-attention (causal + decoder key-padding mask)
    qkv = matmul(x2, p["wqkv"], p["bqkv"]).reshape(B, St, 3 * D)
    q, k, v = qkv[..., :D], qkv[..., D:2 * D], qkv[..., 2 * D:]
    attn = fused_attention(q, k, v, dec_key_mask, n_heads=n_heads, causal=True)
    out1 = matmul_residual_layernorm(attn.reshape(B * St, D), p["wo"], p["bo"],
                                     x2, p["g1"], p["be1"])

    # cross-attention (queries from decoder, keys/values from encoder output)
    q2 = matmul(out1, p["wq2"], p["bq2"]).reshape(B, St, D)
    kv2 = matmul(enc2, p["wkv2"], p["bkv2"]).reshape(B, Ss, 2 * D)
    k2, v2 = kv2[..., :D], kv2[..., D:]
    attn2 = fused_attention(q2, k2, v2, enc_key_mask, n_heads=n_heads, causal=False)
    out2 = matmul_residual_layernorm(attn2.reshape(B * St, D), p["wo2"], p["bo2"],
                                     out1, p["g2"], p["be2"])

    out = ffn_residual_layernorm(out2, p["w1"], p["bf1"], p["w2"], p["bf2"],
                                 p["g3"], p["be3"])
    return out.reshape(B, St, D)


def make_positional_encoding(max_seq_len, m_dim):
    pos = jnp.arange(max_seq_len, dtype=jnp.float32)[:, None]
    i = jnp.arange(0, m_dim, 2, dtype=jnp.float32)
    div = 1.0 / jnp.power(10000.0, 2.0 * i / m_dim)
    pe = jnp.zeros((max_seq_len, m_dim), jnp.float32)
    pe = pe.at[:, 0::2].set(jnp.sin(pos * div))
    pe = pe.at[:, 1::2].set(jnp.cos(pos * div))
    return pe


@functools.partial(jax.jit, static_argnames=("n_heads",))
def transformer_forward(params, src_tokens, enc_mask, tgt_tokens, dec_mask, *, n_heads):
    emb = params["embedding"]           # f32 (V, D)
    pe = params["pe"]
    D = emb.shape[1]
    B, Ss = src_tokens.shape
    St = tgt_tokens.shape[1]

    # TODO(synk): embedding gather kept in plain JAX (no clean rectangular BlockSpec gather).
    src = (emb[src_tokens] * math.sqrt(D) + pe[:Ss][None, :, :]).astype(jnp.bfloat16)
    tgt = (emb[tgt_tokens] * math.sqrt(D) + pe[:St][None, :, :]).astype(jnp.bfloat16)

    enc_out = src
    for p in params["encoder_layers"]:
        enc_out = encoder_layer(p, enc_out, enc_mask, n_heads)

    dec_out = tgt
    for p in params["decoder_layers"]:
        dec_out = decoder_layer(p, dec_out, enc_out, enc_mask, dec_mask, n_heads)

    # logits = decoder_output @ embedding.T  (contract on m_dim; emb cast to bf16
    # in-register inside the kernel; big tiles + padded vocab tail for the vocab axis)
    logits = matmul(dec_out.reshape(B * St, D), emb, None, trans_rhs=True,
                    out_dtype=jnp.float32, tm_target=256, tn_target=512, tk_target=512)
    return logits.reshape(B, St, emb.shape[0])


# ----------------------------- deterministic init (matches PyTorch layout) -----------------------------

def _init_linear(key, d_in, d_out):
    k1, k2 = jax.random.split(key)
    bound = 1.0 / math.sqrt(d_in)
    w = jax.random.uniform(k1, (d_in, d_out), jnp.float32, -bound, bound)
    b = jax.random.uniform(k2, (d_out,), jnp.float32, -bound, bound)
    return w, b


def _bf16(w):
    return w.astype(jnp.bfloat16)


def _init_encoder_layer(key, m_dim, n_heads):
    ks = jax.random.split(key, 6)
    wq, bq = _init_linear(ks[0], m_dim, m_dim)
    wk, bk = _init_linear(ks[1], m_dim, m_dim)
    wv, bv = _init_linear(ks[2], m_dim, m_dim)
    p = {"wqkv": _bf16(jnp.concatenate([wq, wk, wv], axis=1)),
         "bqkv": jnp.concatenate([bq, bk, bv], axis=0)}
    wo, p["bo"] = _init_linear(ks[3], m_dim, m_dim)
    p["wo"] = _bf16(wo)
    p["g1"], p["be1"] = jnp.ones((m_dim,), jnp.float32), jnp.zeros((m_dim,), jnp.float32)
    w1, p["bf1"] = _init_linear(ks[4], m_dim, 2 * m_dim)
    w2, p["bf2"] = _init_linear(ks[5], 2 * m_dim, m_dim)
    p["w1"], p["w2"] = _bf16(w1), _bf16(w2)
    p["g2"], p["be2"] = jnp.ones((m_dim,), jnp.float32), jnp.zeros((m_dim,), jnp.float32)
    return p


def _init_decoder_layer(key, m_dim, n_heads):
    ks = jax.random.split(key, 10)
    wq, bq = _init_linear(ks[0], m_dim, m_dim)
    wk, bk = _init_linear(ks[1], m_dim, m_dim)
    wv, bv = _init_linear(ks[2], m_dim, m_dim)
    p = {"wqkv": _bf16(jnp.concatenate([wq, wk, wv], axis=1)),
         "bqkv": jnp.concatenate([bq, bk, bv], axis=0)}
    wo, p["bo"] = _init_linear(ks[3], m_dim, m_dim)
    p["wo"] = _bf16(wo)
    p["g1"], p["be1"] = jnp.ones((m_dim,), jnp.float32), jnp.zeros((m_dim,), jnp.float32)
    wq2, p["bq2"] = _init_linear(ks[4], m_dim, m_dim)
    p["wq2"] = _bf16(wq2)
    wk2, bk2 = _init_linear(ks[5], m_dim, m_dim)
    wv2, bv2 = _init_linear(ks[6], m_dim, m_dim)
    p["wkv2"] = _bf16(jnp.concatenate([wk2, wv2], axis=1))
    p["bkv2"] = jnp.concatenate([bk2, bv2], axis=0)
    wo2, p["bo2"] = _init_linear(ks[7], m_dim, m_dim)
    p["wo2"] = _bf16(wo2)
    p["g2"], p["be2"] = jnp.ones((m_dim,), jnp.float32), jnp.zeros((m_dim,), jnp.float32)
    w1, p["bf1"] = _init_linear(ks[8], m_dim, 2 * m_dim)
    w2, p["bf2"] = _init_linear(ks[9], 2 * m_dim, m_dim)
    p["w1"], p["w2"] = _bf16(w1), _bf16(w2)
    p["g3"], p["be3"] = jnp.ones((m_dim,), jnp.float32), jnp.zeros((m_dim,), jnp.float32)
    return p


def init_transformer(key, n_layers, m_dim, n_heads, vocab_size, max_seq_len):
    keys = jax.random.split(key, 1 + 2 * n_layers)
    return {
        "embedding": jax.random.normal(keys[0], (vocab_size, m_dim), jnp.float32),
        "pe": make_positional_encoding(max_seq_len, m_dim),
        "encoder_layers": [_init_encoder_layer(keys[1 + i], m_dim, n_heads)
                           for i in range(n_layers)],
        "decoder_layers": [_init_decoder_layer(keys[1 + n_layers + i], m_dim, n_heads)
                           for i in range(n_layers)],
    }


# ----------------------------- demo -----------------------------

if __name__ == "__main__":
    n_layers, m_dim, n_heads = 2, 32, 4
    vocab_size, max_seq_len = 64, 16
    B, Ssrc, Stgt = 2, 8, 8

    key = jax.random.PRNGKey(0)
    kp, ks, kt = jax.random.split(key, 3)
    params = init_transformer(kp, n_layers, m_dim, n_heads, vocab_size, max_seq_len)

    source_tokens = jax.random.randint(ks, (B, Ssrc), 0, vocab_size, dtype=jnp.int32)
    target_tokens = jax.random.randint(kt, (B, Stgt), 0, vocab_size, dtype=jnp.int32)
    encoder_attention_mask = jnp.array([[1] * 8, [1] * 6 + [0] * 2], dtype=jnp.int32)
    decoder_attention_mask = jnp.array([[1] * 8, [1] * 7 + [0] * 1], dtype=jnp.int32)

    logits = transformer_forward(params, source_tokens, encoder_attention_mask,
                                 target_tokens, decoder_attention_mask,
                                 n_heads=n_heads)
    logits = jax.block_until_ready(logits)

    assert logits.shape == (B, Stgt, vocab_size), logits.shape
    assert bool(jnp.all(jnp.isfinite(logits)))
    print("KERNEL_OK")
</pallas_src>

<mosaic_0001>
module attributes {stable_mosaic.version = 11 : i64} {
  func.func @_matmul_kernel(%arg0: i32, %arg1: i32, %arg2: i32, %arg3: memref<16x32xbf16, #tpu.memory_space<vmem>>, %arg4: memref<32x96xbf16, #tpu.memory_space<vmem>>, %arg5: memref<1x96xf32, #tpu.memory_space<vmem>>, %arg6: memref<16x96xbf16, #tpu.memory_space<vmem>>, %arg7: memref<16x96xf32, #tpu.memory_space<vmem>>) attributes {dimension_semantics = [#tpu.dimension_semantics<parallel>, #tpu.dimension_semantics<parallel>, #tpu.dimension_semantics<arbitrary>], iteration_bounds = array<i64: 1, 1, 1>, scalar_prefetch = 0 : i64, scratch_operands = 1 : i64, tpu.core_type = #tpu.core_type<tc>, window_params = [{transform_indices = @transform_0, window_bounds = array<i64: 16, 32>}, {transform_indices = @transform_1, window_bounds = array<i64: 32, 96>}, {transform_indices = @transform_2, window_bounds = array<i64: 1, 96>}, {transform_indices = @transform_3, window_bounds = array<i64: 16, 96>}]} {
    %c0_i32 = arith.constant 0 : i32
    %0 = arith.cmpi eq, %arg2, %c0_i32 : i32
    %1 = arith.extui %0 : i1 to i32
    %c0_i32_0 = arith.constant 0 : i32
    %2 = arith.cmpi ne, %1, %c0_i32_0 : i32
    scf.if %2 {
      %cst_10 = arith.constant 0.000000e+00 : f32
      %12 = vector.broadcast %cst_10 : f32 to vector<16x96xf32>
      %c0_11 = arith.constant 0 : index
      %c0_12 = arith.constant 0 : index
      %13 = vector.load %arg7[%c0_11, %c0_12] : memref<16x96xf32, #tpu.memory_space<vmem>>, vector<16x96xf32>
      tpu.vector_store %arg7[%c0_11, %c0_12], %12 {strides = array<i32>} : memref<16x96xf32, #tpu.memory_space<vmem>>, vector<16x96xf32>,
    } else {
    }
    %c0 = arith.constant 0 : index
    %c0_1 = arith.constant 0 : index
    %3 = vector.load %arg3[%c0, %c0_1] : memref<16x32xbf16, #tpu.memory_space<vmem>>, vector<16x32xbf16>
    %c0_2 = arith.constant 0 : index
    %c0_3 = arith.constant 0 : index
    %4 = vector.load %arg4[%c0_2, %c0_3] : memref<32x96xbf16, #tpu.memory_space<vmem>>, vector<32x96xbf16>
    %c0_4 = arith.constant 0 : index
    %c0_5 = arith.constant 0 : index
    %5 = vector.load %arg7[%c0_4, %c0_5] : memref<16x96xf32, #tpu.memory_space<vmem>>, vector<16x96xf32>
    %cst = arith.constant dense<0.000000e+00> : vector<16x96xf32>
    %6 = tpu.matmul %3, %4, %cst {dimension_numbers = #tpu.dot_dimension_numbers<[1], [0], [0], [1], [0, 0, 1, 1], [], []>} : vector<16x32xbf16>, vector<32x96xbf16>, vector<16x96xf32> -> vector<16x96xf32>
    %7 = arith.addf %5, %6 : vector<16x96xf32>
    %c0_6 = arith.constant 0 : index
    %c0_7 = arith.constant 0 : index
    %8 = vector.load %arg7[%c0_6, %c0_7] : memref<16x96xf32, #tpu.memory_space<vmem>>, vector<16x96xf32>
    tpu.vector_store %arg7[%c0_6, %c0_7], %7 {strides = array<i32>} : memref<16x96xf32, #tpu.memory_space<vmem>>, vector<16x96xf32>,
    %c0_i32_8 = arith.constant 0 : i32
    %9 = arith.cmpi eq, %arg2, %c0_i32_8 : i32
    %10 = arith.extui %9 : i1 to i32
    %c0_i32_9 = arith.constant 0 : i32
    %11 = arith.cmpi ne, %10, %c0_i32_9 : i32
    scf.if %11 {
      %c0_10 = arith.constant 0 : index
      %c0_11 = arith.constant 0 : index
      %12 = vector.load %arg7[%c0_10, %c0_11] : memref<16x96xf32, #tpu.memory_space<vmem>>, vector<16x96xf32>
      %c0_12 = arith.constant 0 : index
      %c0_13 = arith.constant 0 : index
      %13 = vector.load %arg5[%c0_12, %c0_13] : memref<1x96xf32, #tpu.memory_space<vmem>>, vector<1x96xf32>
      %14 = vector.broadcast %13 : vector<1x96xf32> to vector<16x96xf32>
      %15 = arith.addf %12, %14 : vector<16x96xf32>
      %16 = arith.truncf %15 : vector<16x96xf32> to vector<16x96xbf16>
      %c0_14 = arith.constant 0 : index
      %c0_15 = arith.constant 0 : index
      %17 = vector.load %arg6[%c0_14, %c0_15] : memref<16x96xbf16, #tpu.memory_space<vmem>>, vector<16x96xbf16>
      tpu.vector_store %arg6[%c0_14, %c0_15], %16 {strides = array<i32>} : memref<16x96xbf16, #tpu.memory_space<vmem>>, vector<16x96xbf16>,
    } else {
    }
    return
  }
  func.func @transform_0(%arg0: i32, %arg1: i32, %arg2: i32) -> (i32, i32) {
    %c0_i32 = arith.constant 0 : i32
    return %arg0, %arg2 : i32, i32
  }
  func.func @transform_1(%arg0: i32, %arg1: i32, %arg2: i32) -> (i32, i32) {
    %c0_i32 = arith.constant 0 : i32
    return %arg2, %arg1 : i32, i32
  }
  func.func @transform_2(%arg0: i32, %arg1: i32, %arg2: i32) -> (i32, i32) {
    %c0_i32 = arith.constant 0 : i32
    %c0_i32_0 = arith.constant 0 : i32
    return %c0_i32, %arg1 : i32, i32
  }
  func.func @transform_3(%arg0: i32, %arg1: i32, %arg2: i32) -> (i32, i32) {
    %c0_i32 = arith.constant 0 : i32
    return %arg0, %arg1 : i32, i32
  }
}

module attributes {stable_mosaic.version = 11 : i64} {
  func.func @_flash_attn_kernel(%arg0: i32, %arg1: i32, %arg2: i32, %arg3: i32, %arg4: memref<1x1x8xf32, #tpu.memory_space<vmem>>, %arg5: memref<1x1x8x8xbf16, #tpu.memory_space<vmem>>, %arg6: memref<1x1x8x8xbf16, #tpu.memory_space<vmem>>, %arg7: memref<1x1x8x8xbf16, #tpu.memory_space<vmem>>, %arg8: memref<1x1x8x8xbf16, #tpu.memory_space<vmem>>, %arg9: memref<8x1xf32, #tpu.memory_space<vmem>>, %arg10: memref<8x1xf32, #tpu.memory_space<vmem>>, %arg11: memref<8x8xf32, #tpu.memory_space<vmem>>) attributes {dimension_semantics = [#tpu.dimension_semantics<parallel>, #tpu.dimension_semantics<parallel>, #tpu.dimension_semantics<parallel>, #tpu.dimension_semantics<arbitrary>], iteration_bounds = array<i64: 2, 4, 1, 1>, scalar_prefetch = 0 : i64, scratch_operands = 3 : i64, tpu.core_type = #tpu.core_type<tc>, window_params = [{transform_indices = @transform_0, window_bounds = array<i64: 1, 1, 8>}, {transform_indices = @transform_1, window_bounds = array<i64: 1, 1, 8, 8>}, {transform_indices = @transform_2, window_bounds = array<i64: 1, 1, 8, 8>}, {transform_indices = @transform_3, window_bounds = array<i64: 1, 1, 8, 8>}, {transform_indices = @transform_4, window_bounds = array<i64: 1, 1, 8, 8>}]} {
    %c0_i32 = arith.constant 0 : i32
    %0 = arith.cmpi eq, %arg3, %c0_i32 : i32
    %1 = arith.extui %0 : i1 to i32
    %c0_i32_0 = arith.constant 0 : i32
    %2 = arith.cmpi ne, %1, %c0_i32_0 : i32
    scf.if %2 {
      %cst_35 = arith.constant -1.000000e+30 : f32
      %53 = vector.broadcast %cst_35 : f32 to vector<8x1xf32>
      %c0_36 = arith.constant 0 : index
      %c0_37 = arith.constant 0 : index
      %54 = vector.load %arg9[%c0_36, %c0_37] : memref<8x1xf32, #tpu.memory_space<vmem>>, vector<8x1xf32>
      tpu.vector_store %arg9[%c0_36, %c0_37], %53 {strides = array<i32>} : memref<8x1xf32, #tpu.memory_space<vmem>>, vector<8x1xf32>,
      %cst_38 = arith.constant 0.000000e+00 : f32
      %55 = vector.broadcast %cst_38 : f32 to vector<8x1xf32>
      %c0_39 = arith.constant 0 : index
      %c0_40 = arith.constant 0 : index
      %56 = vector.load %arg10[%c0_39, %c0_40] : memref<8x1xf32, #tpu.memory_space<vmem>>, vector<8x1xf32>
      tpu.vector_store %arg10[%c0_39, %c0_40], %55 {strides = array<i32>} : memref<8x1xf32, #tpu.memory_space<vmem>>, vector<8x1xf32>,
      %cst_41 = arith.constant 0.000000e+00 : f32
      %57 = vector.broadcast %cst_41 : f32 to vector<8x8xf32>
      %c0_42 = arith.constant 0 : index
      %c0_43 = arith.constant 0 : index
      %58 = vector.load %arg11[%c0_42, %c0_43] : memref<8x8xf32, #tpu.memory_space<vmem>>, vector<8x8xf32>
      tpu.vector_store %arg11[%c0_42, %c0_43], %57 {strides = array<i32>} : memref<8x8xf32, #tpu.memory_space<vmem>>, vector<8x8xf32>,
    } else {
    }
    %c0 = arith.constant 0 : index
    %c0_1 = arith.constant 0 : index
    %c0_2 = arith.constant 0 : index
    %c0_3 = arith.constant 0 : index
    %3 = vector.load %arg5[%c0, %c0_1, %c0_2, %c0_3] : memref<1x1x8x8xbf16, #tpu.memory_space<vmem>>, vector<1x1x8x8xbf16>
    %4 = vector.shape_cast %3 : vector<1x1x8x8xbf16> to vector<8x8xbf16>
    %c0_4 = arith.constant 0 : index
    %c0_5 = arith.constant 0 : index
    %c0_6 = arith.constant 0 : index
    %c0_7 = arith.constant 0 : index
    %5 = vector.load %arg6[%c0_4, %c0_5, %c0_6, %c0_7] : memref<1x1x8x8xbf16, #tpu.memory_space<vmem>>, vector<1x1x8x8xbf16>
    %6 = vector.shape_cast %5 : vector<1x1x8x8xbf16> to vector<8x8xbf16>
    %cst = arith.constant dense<0.000000e+00> : vector<8x8xf32>
    %7 = tpu.matmul %4, %6, %cst {dimension_numbers = #tpu.dot_dimension_numbers<[1], [1], [0], [0], [0, 0, 1, 0], [], []>} : vector<8x8xbf16>, vector<8x8xbf16>, vector<8x8xf32> -> vector<8x8xf32>
    %c0_8 = arith.constant 0 : index
    %c0_9 = arith.constant 0 : index
    %c0_10 = arith.constant 0 : index
    %8 = vector.load %arg4[%c0_8, %c0_9, %c0_10] : memref<1x1x8xf32, #tpu.memory_space<vmem>>, vector<1x1x8xf32>
    %9 = vector.shape_cast %8 : vector<1x1x8xf32> to vector<1x8xf32>
    %cst_11 = arith.constant 5.000000e-01 : f32
    %10 = vector.broadcast %cst_11 : f32 to vector<1x8xf32>
    %11 = arith.cmpf ogt, %9, %10 : vector<1x8xf32>
    %c8_i32 = arith.constant 8 : i32
    %12 = arith.muli %arg2, %c8_i32 : i32
    %13 = tpu.iota {dimensions = array<i32: 0>} : vector<8x8xi32>
    %14 = vector.broadcast %12 : i32 to vector<8x8xi32>
    %15 = arith.addi %14, %13 : vector<8x8xi32>
    %c8_i32_12 = arith.constant 8 : i32
    %16 = arith.muli %arg3, %c8_i32_12 : i32
    %17 = tpu.iota {dimensions = array<i32: 1>} : vector<8x8xi32>
    %18 = vector.broadcast %16 : i32 to vector<8x8xi32>
    %19 = arith.addi %18, %17 : vector<8x8xi32>
    %20 = arith.cmpi sle, %19, %15 : vector<8x8xi32>
    %21 = vector.broadcast %11 : vector<1x8xi1> to vector<8x8xi1>
    %22 = arith.andi %21, %20 : vector<8x8xi1>
    %cst_13 = arith.constant -1.000000e+09 : f32
    %23 = vector.broadcast %cst_13 : f32 to vector<8x8xf32>
    %24 = arith.select %22, %7, %23 : vector<8x8xi1>, vector<8x8xf32>
    %c0_14 = arith.constant 0 : index
    %c0_15 = arith.constant 0 : index
    %25 = vector.load %arg9[%c0_14, %c0_15] : memref<8x1xf32, #tpu.memory_space<vmem>>, vector<8x1xf32>
    %cst_16 = arith.constant dense<0xFF800000> : vector<8xf32>
    %26 = vector.multi_reduction <maximumf>, %24, %cst_16 [1] : vector<8x8xf32> to vector<8xf32>
    %27 = vector.shape_cast %26 : vector<8xf32> to vector<8x1xf32>
    %28 = arith.maximumf %25, %27 : vector<8x1xf32>
    %29 = arith.subf %25, %28 : vector<8x1xf32>
    %30 = math.exp %29 : vector<8x1xf32>
    %31 = vector.broadcast %28 : vector<8x1xf32> to vector<8x8xf32>
    %32 = arith.subf %24, %31 : vector<8x8xf32>
    %33 = math.exp %32 : vector<8x8xf32>
    %c0_17 = arith.constant 0 : index
    %c0_18 = arith.constant 0 : index
    %34 = vector.load %arg10[%c0_17, %c0_18] : memref<8x1xf32, #tpu.memory_space<vmem>>, vector<8x1xf32>
    %35 = arith.mulf %30, %34 : vector<8x1xf32>
    %cst_19 = arith.constant dense<0.000000e+00> : vector<8xf32>
    %36 = vector.multi_reduction <add>, %33, %cst_19 [1] : vector<8x8xf32> to vector<8xf32>
    %37 = vector.shape_cast %36 : vector<8xf32> to vector<8x1xf32>
    %38 = arith.addf %35, %37 : vector<8x1xf32>
    %c0_20 = arith.constant 0 : index
    %c0_21 = arith.constant 0 : index
    %39 = vector.load %arg10[%c0_20, %c0_21] : memref<8x1xf32, #tpu.memory_space<vmem>>, vector<8x1xf32>
    tpu.vector_store %arg10[%c0_20, %c0_21], %38 {strides = array<i32>} : memref<8x1xf32, #tpu.memory_space<vmem>>, vector<8x1xf32>,
    %c0_22 = arith.constant 0 : index
    %c0_23 = arith.constant 0 : index
    %40 = vector.load %arg11[%c0_22, %c0_23] : memref<8x8xf32, #tpu.memory_space<vmem>>, vector<8x8xf32>
    %41 = vector.broadcast %30 : vector<8x1xf32> to vector<8x8xf32>
    %42 = arith.mulf %41, %40 : vector<8x8xf32>
    %43 = arith.truncf %33 : vector<8x8xf32> to vector<8x8xbf16>
    %c0_24 = arith.constant 0 : index
    %c0_25 = arith.constant 0 : index
    %c0_26 = arith.constant 0 : index
    %c0_27 = arith.constant 0 : index
    %44 = vector.load %arg7[%c0_24, %c0_25, %c0_26, %c0_27] : memref<1x1x8x8xbf16, #tpu.memory_space<vmem>>, vector<1x1x8x8xbf16>
    %45 = vector.shape_cast %44 : vector<1x1x8x8xbf16> to vector<8x8xbf16>
    %cst_28 = arith.constant dense<0.000000e+00> : vector<8x8xf32>
    %46 = tpu.matmul %43, %45, %cst_28 {dimension_numbers = #tpu.dot_dimension_numbers<[1], [0], [0], [1], [0, 0, 1, 1], [], []>} : vector<8x8xbf16>, vector<8x8xbf16>, vector<8x8xf32> -> vector<8x8xf32>
    %47 = arith.addf %42, %46 : vector<8x8xf32>
    %c0_29 = arith.constant 0 : index
    %c0_30 = arith.constant 0 : index
    %48 = vector.load %arg11[%c0_29, %c0_30] : memref<8x8xf32, #tpu.memory_space<vmem>>, vector<8x8xf32>
    tpu.vector_store %arg11[%c0_29, %c0_30], %47 {strides = array<i32>} : memref<8x8xf32, #tpu.memory_space<vmem>>, vector<8x8xf32>,
    %c0_31 = arith.constant 0 : index
    %c0_32 = arith.constant 0 : index
    %49 = vector.load %arg9[%c0_31, %c0_32] : memref<8x1xf32, #tpu.memory_space<vmem>>, vector<8x1xf32>
    tpu.vector_store %arg9[%c0_31, %c0_32], %28 {strides = array<i32>} : memref<8x1xf32, #tpu.memory_space<vmem>>, vector<8x1xf32>,
    %c0_i32_33 = arith.constant 0 : i32
    %50 = arith.cmpi eq, %arg3, %c0_i32_33 : i32
    %51 = arith.extui %50 : i1 to i32
    %c0_i32_34 = arith.constant 0 : i32
    %52 = arith.cmpi ne, %51, %c0_i32_34 : i32
    scf.if %52 {
      %c0_35 = arith.constant 0 : index
      %c0_36 = arith.constant 0 : index
      %53 = vector.load %arg11[%c0_35, %c0_36] : memref<8x8xf32, #tpu.memory_space<vmem>>, vector<8x8xf32>
      %c0_37 = arith.constant 0 : index
      %c0_38 = arith.constant 0 : index
      %54 = vector.load %arg10[%c0_37, %c0_38] : memref<8x1xf32, #tpu.memory_space<vmem>>, vector<8x1xf32>
      %55 = tpu.reciprocal %54 {approx = true} : vector<8x1xf32> -> vector<8x1xf32>
      %56 = vector.broadcast %55 : vector<8x1xf32> to vector<8x8xf32>
      %57 = arith.mulf %53, %56 : vector<8x8xf32>
      %58 = arith.truncf %57 : vector<8x8xf32> to vector<8x8xbf16>
      %c0_39 = arith.constant 0 : index
      %c0_40 = arith.constant 0 : index
      %c0_41 = arith.constant 0 : index
      %c0_42 = arith.constant 0 : index
      %59 = vector.load %arg8[%c0_39, %c0_40, %c0_41, %c0_42] : memref<1x1x8x8xbf16, #tpu.memory_space<vmem>>, vector<1x1x8x8xbf16>
      %60 = vector.shape_cast %59 : vector<1x1x8x8xbf16> to vector<8x8xbf16>
      %61 = vector.shape_cast %58 : vector<8x8xbf16> to vector<1x1x8x8xbf16>
      tpu.vector_store %arg8[%c0_39, %c0_40, %c0_41, %c0_42], %61 {strides = array<i32>} : memref<1x1x8x8xbf16, #tpu.memory_space<vmem>>, vector<1x1x8x8xbf16>,
    } else {
    }
    return
  }
  func.func @transform_0(%arg0: i32, %arg1: i32, %arg2: i32, %arg3: i32) -> (i32, i32, i32) {
    %c0_i32 = arith.constant 0 : i32
    %c0_i32_0 = arith.constant 0 : i32
    return %arg0, %c0_i32, %arg3 : i32, i32, i32
  }
  func.func @transform_1(%arg0: i32, %arg1: i32, %arg2: i32, %arg3: i32) -> (i32, i32, i32, i32) {
    %c0_i32 = arith.constant 0 : i32
    %c0_i32_0 = arith.constant 0 : i32
    return %arg0, %arg1, %arg2, %c0_i32 : i32, i32, i32, i32
  }
  func.func @transform_2(%arg0: i32, %arg1: i32, %arg2: i32, %arg3: i32) -> (i32, i32, i32, i32) {
    %c0_i32 = arith.constant 0 : i32
    %c0_i32_0 = arith.constant 0 : i32
    return %arg0, %arg1, %arg3, %c0_i32 : i32, i32, i32, i32
  }
  func.func @transform_3(%arg0: i32, %arg1: i32, %arg2: i32, %arg3: i32) -> (i32, i32, i32, i32) {
    %c0_i32 = arith.constant 0 : i32
    %c0_i32_0 = arith.constant 0 : i32
    return %arg0, %arg1, %arg3, %c0_i32 : i32, i32, i32, i32
  }
  func.func @transform_4(%arg0: i32, %arg1: i32, %arg2: i32, %arg3: i32) -> (i32, i32, i32, i32) {
    %c0_i32 = arith.constant 0 : i32
    %c0_i32_0 = arith.constant 0 : i32
    return %arg0, %arg1, %arg2, %c0_i32 : i32, i32, i32, i32
  }
}

module attributes {stable_mosaic.version = 11 : i64} {
  func.func @_matmul_kernel(%arg0: i32, %arg1: i32, %arg2: i32, %arg3: memref<16x32xbf16, #tpu.memory_space<vmem>>, %arg4: memref<32x32xbf16, #tpu.memory_space<vmem>>, %arg5: memref<1x32xf32, #tpu.memory_space<vmem>>, %arg6: memref<16x32xbf16, #tpu.memory_space<vmem>>, %arg7: memref<16x32xf32, #tpu.memory_space<vmem>>) attributes {dimension_semantics = [#tpu.dimension_semantics<parallel>, #tpu.dimension_semantics<parallel>, #tpu.dimension_semantics<arbitrary>], iteration_bounds = array<i64: 1, 1, 1>, scalar_prefetch = 0 : i64, scratch_operands = 1 : i64, tpu.core_type = #tpu.core_type<tc>, window_params = [{transform_indices = @transform_0, window_bounds = array<i64: 16, 32>}, {transform_indices = @transform_1, window_bounds = array<i64: 32, 32>}, {transform_indices = @transform_2, window_bounds = array<i64: 1, 32>}, {transform_indices = @transform_3, window_bounds = array<i64: 16, 32>}]} {
    %c0_i32 = arith.constant 0 : i32
    %0 = arith.cmpi eq, %arg2, %c0_i32 : i32
    %1 = arith.extui %0 : i1 to i32
    %c0_i32_0 = arith.constant 0 : i32
    %2 = arith.cmpi ne, %1, %c0_i32_0 : i32
    scf.if %2 {
      %cst_10 = arith.constant 0.000000e+00 : f32
      %12 = vector.broadcast %cst_10 : f32 to vector<16x32xf32>
      %c0_11 = arith.constant 0 : index
      %c0_12 = arith.constant 0 : index
      %13 = vector.load %arg7[%c0_11, %c0_12] : memref<16x32xf32, #tpu.memory_space<vmem>>, vector<16x32xf32>
      tpu.vector_store %arg7[%c0_11, %c0_12], %12 {strides = array<i32>} : memref<16x32xf32, #tpu.memory_space<vmem>>, vector<16x32xf32>,
    } else {
    }
    %c0 = arith.constant 0 : index
    %c0_1 = arith.constant 0 : index
    %3 = vector.load %arg3[%c0, %c0_1] : memref<16x32xbf16, #tpu.memory_space<vmem>>, vector<16x32xbf16>
    %c0_2 = arith.constant 0 : index
    %c0_3 = arith.constant 0 : index
    %4 = vector.load %arg4[%c0_2, %c0_3] : memref<32x32xbf16, #tpu.memory_space<vmem>>, vector<32x32xbf16>
    %c0_4 = arith.constant 0 : index
    %c0_5 = arith.constant 0 : index
    %5 = vector.load %arg7[%c0_4, %c0_5] : memref<16x32xf32, #tpu.memory_space<vmem>>, vector<16x32xf32>
    %cst = arith.constant dense<0.000000e+00> : vector<16x32xf32>
    %6 = tpu.matmul %3, %4, %cst {dimension_numbers = #tpu.dot_dimension_numbers<[1], [0], [0], [1], [0, 0, 1, 1], [], []>} : vector<16x32xbf16>, vector<32x32xbf16>, vector<16x32xf32> -> vector<16x32xf32>
    %7 = arith.addf %5, %6 : vector<16x32xf32>
    %c0_6 = arith.constant 0 : index
    %c0_7 = arith.constant 0 : index
    %8 = vector.load %arg7[%c0_6, %c0_7] : memref<16x32xf32, #tpu.memory_space<vmem>>, vector<16x32xf32>
    tpu.vector_store %arg7[%c0_6, %c0_7], %7 {strides = array<i32>} : memref<16x32xf32, #tpu.memory_space<vmem>>, vector<16x32xf32>,
    %c0_i32_8 = arith.constant 0 : i32
    %9 = arith.cmpi eq, %arg2, %c0_i32_8 : i32
    %10 = arith.extui %9 : i1 to i32
    %c0_i32_9 = arith.constant 0 : i32
    %11 = arith.cmpi ne, %10, %c0_i32_9 : i32
    scf.if %11 {
      %c0_10 = arith.constant 0 : index
      %c0_11 = arith.constant 0 : index
      %12 = vector.load %arg7[%c0_10, %c0_11] : memref<16x32xf32, #tpu.memory_space<vmem>>, vector<16x32xf32>
      %c0_12 = arith.constant 0 : index
      %c0_13 = arith.constant 0 : index
      %13 = vector.load %arg5[%c0_12, %c0_13] : memref<1x32xf32, #tpu.memory_space<vmem>>, vector<1x32xf32>
      %14 = vector.broadcast %13 : vector<1x32xf32> to vector<16x32xf32>
      %15 = arith.addf %12, %14 : vector<16x32xf32>
      %16 = arith.truncf %15 : vector<16x32xf32> to vector<16x32xbf16>
      %c0_14 = arith.constant 0 : index
      %c0_15 = arith.constant 0 : index
      %17 = vector.load %arg6[%c0_14, %c0_15] : memref<16x32xbf16, #tpu.memory_space<vmem>>, vector<16x32xbf16>
      tpu.vector_store %arg6[%c0_14, %c0_15], %16 {strides = array<i32>} : memref<16x32xbf16, #tpu.memory_space<vmem>>, vector<16x32xbf16>,
    } else {
    }
    return
  }
  func.func @transform_0(%arg0: i32, %arg1: i32, %arg2: i32) -> (i32, i32) {
    %c0_i32 = arith.constant 0 : i32
    return %arg0, %arg2 : i32, i32
  }
  func.func @transform_1(%arg0: i32, %arg1: i32, %arg2: i32) -> (i32, i32) {
    %c0_i32 = arith.constant 0 : i32
    return %arg2, %arg1 : i32, i32
  }
  func.func @transform_2(%arg0: i32, %arg1: i32, %arg2: i32) -> (i32, i32) {
    %c0_i32 = arith.constant 0 : i32
    %c0_i32_0 = arith.constant 0 : i32
    return %c0_i32, %arg1 : i32, i32
  }
  func.func @transform_3(%arg0: i32, %arg1: i32, %arg2: i32) -> (i32, i32) {
    %c0_i32 = arith.constant 0 : i32
    return %arg0, %arg1 : i32, i32
  }
}

module attributes {stable_mosaic.version = 11 : i64} {
  func.func @_mm_res_ln_kernel(%arg0: i32, %arg1: i32, %arg2: memref<16x32xbf16, #tpu.memory_space<vmem>>, %arg3: memref<32x32xbf16, #tpu.memory_space<vmem>>, %arg4: memref<1x32xf32, #tpu.memory_space<vmem>>, %arg5: memref<16x32xbf16, #tpu.memory_space<vmem>>, %arg6: memref<1x32xf32, #tpu.memory_space<vmem>>, %arg7: memref<1x32xf32, #tpu.memory_space<vmem>>, %arg8: memref<16x32xbf16, #tpu.memory_space<vmem>>, %arg9: memref<16x32xf32, #tpu.memory_space<vmem>>) attributes {dimension_semantics = [#tpu.dimension_semantics<parallel>, #tpu.dimension_semantics<arbitrary>], iteration_bounds = array<i64: 1, 1>, scalar_prefetch = 0 : i64, scratch_operands = 1 : i64, tpu.core_type = #tpu.core_type<tc>, window_params = [{transform_indices = @transform_0, window_bounds = array<i64: 16, 32>}, {transform_indices = @transform_1, window_bounds = array<i64: 32, 32>}, {pipeline_mode = #tpu.pipeline_mode<synchronous>, transform_indices = @transform_2, window_bounds = array<i64: 1, 32>}, {transform_indices = @transform_3, window_bounds = array<i64: 16, 32>}, {pipeline_mode = #tpu.pipeline_mode<synchronous>, transform_indices = @transform_4, window_bounds = array<i64: 1, 32>}, {pipeline_mode = #tpu.pipeline_mode<synchronous>, transform_indices = @transform_5, window_bounds = array<i64: 1, 32>}, {transform_indices = @transform_6, window_bounds = array<i64: 16, 32>}]} {
    %c0_i32 = arith.constant 0 : i32
    %0 = arith.cmpi eq, %arg1, %c0_i32 : i32
    %1 = arith.extui %0 : i1 to i32
    %c0_i32_0 = arith.constant 0 : i32
    %2 = arith.cmpi ne, %1, %c0_i32_0 : i32
    scf.if %2 {
      %cst_10 = arith.constant 0.000000e+00 : f32
      %12 = vector.broadcast %cst_10 : f32 to vector<16x32xf32>
      %c0_11 = arith.constant 0 : index
      %c0_12 = arith.constant 0 : index
      %13 = vector.load %arg9[%c0_11, %c0_12] : memref<16x32xf32, #tpu.memory_space<vmem>>, vector<16x32xf32>
      tpu.vector_store %arg9[%c0_11, %c0_12], %12 {strides = array<i32>} : memref<16x32xf32, #tpu.memory_space<vmem>>, vector<16x32xf32>,
    } else {
    }
    %c0 = arith.constant 0 : index
    %c0_1 = arith.constant 0 : index
    %3 = vector.load %arg9[%c0, %c0_1] : memref<16x32xf32, #tpu.memory_space<vmem>>, vector<16x32xf32>
    %c0_2 = arith.constant 0 : index
    %c0_3 = arith.constant 0 : index
    %4 = vector.load %arg2[%c0_2, %c0_3] : memref<16x32xbf16, #tpu.memory_space<vmem>>, vector<16x32xbf16>
    %c0_4 = arith.constant 0 : index
    %c0_5 = arith.constant 0 : index
    %5 = vector.load %arg3[%c0_4, %c0_5] : memref<32x32xbf16, #tpu.memory_space<vmem>>, vector<32x32xbf16>
    %cst = arith.constant dense<0.000000e+00> : vector<16x32xf32>
    %6 = tpu.matmul %4, %5, %cst {dimension_numbers = #tpu.dot_dimension_numbers<[1], [0], [0], [1], [0, 0, 1, 1], [], []>} : vector<16x32xbf16>, vector<32x32xbf16>, vector<16x32xf32> -> vector<16x32xf32>
    %7 = arith.addf %3, %6 : vector<16x32xf32>
    %c0_6 = arith.constant 0 : index
    %c0_7 = arith.constant 0 : index
    %8 = vector.load %arg9[%c0_6, %c0_7] : memref<16x32xf32, #tpu.memory_space<vmem>>, vector<16x32xf32>
    tpu.vector_store %arg9[%c0_6, %c0_7], %7 {strides = array<i32>} : memref<16x32xf32, #tpu.memory_space<vmem>>, vector<16x32xf32>,
    %c0_i32_8 = arith.constant 0 : i32
    %9 = arith.cmpi eq, %arg1, %c0_i32_8 : i32
    %10 = arith.extui %9 : i1 to i32
    %c0_i32_9 = arith.constant 0 : i32
    %11 = arith.cmpi ne, %10, %c0_i32_9 : i32
    scf.if %11 {
      %c0_10 = arith.constant 0 : index
      %c0_11 = arith.constant 0 : index
      %12 = vector.load %arg9[%c0_10, %c0_11] : memref<16x32xf32, #tpu.memory_space<vmem>>, vector<16x32xf32>
      %c0_12 = arith.constant 0 : index
      %c0_13 = arith.constant 0 : index
      %13 = vector.load %arg4[%c0_12, %c0_13] : memref<1x32xf32, #tpu.memory_space<vmem>>, vector<1x32xf32>
      %14 = vector.broadcast %13 : vector<1x32xf32> to vector<16x32xf32>
      %15 = arith.addf %12, %14 : vector<16x32xf32>
      %c0_14 = arith.constant 0 : index
      %c0_15 = arith.constant 0 : index
      %16 = vector.load %arg5[%c0_14, %c0_15] : memref<16x32xbf16, #tpu.memory_space<vmem>>, vector<16x32xbf16>
      %17 = arith.extf %16 : vector<16x32xbf16> to vector<16x32xf32>
      %18 = arith.addf %15, %17 : vector<16x32xf32>
      %cst_16 = arith.constant dense<0.000000e+00> : vector<16xf32>
      %19 = vector.multi_reduction <add>, %18, %cst_16 [1] : vector<16x32xf32> to vector<16xf32>
      %20 = vector.shape_cast %19 : vector<16xf32> to vector<16x1xf32>
      %cst_17 = arith.constant 3.200000e+01 : f32
      %21 = vector.broadcast %cst_17 : f32 to vector<16x1xf32>
      %22 = arith.divf %20, %21 : vector<16x1xf32>
      %23 = vector.broadcast %22 : vector<16x1xf32> to vector<16x32xf32>
      %24 = arith.subf %18, %23 : vector<16x32xf32>
      %25 = arith.mulf %24, %24 : vector<16x32xf32>
      %cst_18 = arith.constant dense<0.000000e+00> : vector<16xf32>
      %26 = vector.multi_reduction <add>, %25, %cst_18 [1] : vector<16x32xf32> to vector<16xf32>
      %27 = vector.shape_cast %26 : vector<16xf32> to vector<16x1xf32>
      %cst_19 = arith.constant 3.200000e+01 : f32
      %28 = vector.broadcast %cst_19 : f32 to vector<16x1xf32>
      %29 = arith.divf %27, %28 : vector<16x1xf32>
      %30 = vector.broadcast %22 : vector<16x1xf32> to vector<16x32xf32>
      %31 = arith.subf %18, %30 : vector<16x32xf32>
      %cst_20 = arith.constant 9.99999974E-6 : f32
      %32 = vector.broadcast %cst_20 : f32 to vector<16x1xf32>
      %33 = arith.addf %29, %32 : vector<16x1xf32>
      %34 = math.rsqrt %33 : vector<16x1xf32>
      %35 = vector.broadcast %34 : vector<16x1xf32> to vector<16x32xf32>
      %36 = arith.mulf %31, %35 : vector<16x32xf32>
      %c0_21 = arith.constant 0 : index
      %c0_22 = arith.constant 0 : index
      %37 = vector.load %arg6[%c0_21, %c0_22] : memref<1x32xf32, #tpu.memory_space<vmem>>, vector<1x32xf32>
      %38 = vector.broadcast %37 : vector<1x32xf32> to vector<16x32xf32>
      %39 = arith.mulf %36, %38 : vector<16x32xf32>
      %c0_23 = arith.constant 0 : index
      %c0_24 = arith.constant 0 : index
      %40 = vector.load %arg7[%c0_23, %c0_24] : memref<1x32xf32, #tpu.memory_space<vmem>>, vector<1x32xf32>
      %41 = vector.broadcast %40 : vector<1x32xf32> to vector<16x32xf32>
      %42 = arith.addf %39, %41 : vector<16x32xf32>
      %43 = arith.truncf %42 : vector<16x32xf32> to vector<16x32xbf16>
      %c0_25 = arith.constant 0 : index
      %c0_26 = arith.constant 0 : index
      %44 = vector.load %arg8[%c0_25, %c0_26] : memref<16x32xbf16, #tpu.memory_space<vmem>>, vector<16x32xbf16>
      tpu.vector_store %arg8[%c0_25, %c0_26], %43 {strides = array<i32>} : memref<16x32xbf16, #tpu.memory_space<vmem>>, vector<16x32xbf16>,
    } else {
    }
    return
  }
  func.func @transform_0(%arg0: i32, %arg1: i32) -> (i32, i32) {
    %c0_i32 = arith.constant 0 : i32
    return %arg0, %arg1 : i32, i32
  }
  func.func @transform_1(%arg0: i32, %arg1: i32) -> (i32, i32) {
    %c0_i32 = arith.constant 0 : i32
    %c0_i32_0 = arith.constant 0 : i32
    return %arg1, %c0_i32 : i32, i32
  }
  func.func @transform_2(%arg0: i32, %arg1: i32) -> (i32, i32) {
    %c0_i32 = arith.constant 0 : i32
    %c0_i32_0 = arith.constant 0 : i32
    %c0_i32_1 = arith.constant 0 : i32
    return %c0_i32, %c0_i32_0 : i32, i32
  }
  func.func @transform_3(%arg0: i32, %arg1: i32) -> (i32, i32) {
    %c0_i32 = arith.constant 0 : i32
    %c0_i32_0 = arith.constant 0 : i32
    return %arg0, %c0_i32 : i32, i32
  }
  func.func @transform_4(%arg0: i32, %arg1: i32) -> (i32, i32) {
    %c0_i32 = arith.constant 0 : i32
    %c0_i32_0 = arith.constant 0 : i32
    %c0_i32_1 = arith.constant 0 : i32
    return %c0_i32, %c0_i32_0 : i32, i32
  }
  func.func @transform_5(%arg0: i32, %arg1: i32) -> (i32, i32) {
    %c0_i32 = arith.constant 0 : i32
    %c0_i32_0 = arith.constant 0 : i32
    %c0_i32_1 = arith.constant 0 : i32
    return %c0_i32, %c0_i32_0 : i32, i32
  }
  func.func @transform_6(%arg0: i32, %arg1: i32) -> (i32, i32) {
    %c0_i32 = arith.constant 0 : i32
    %c0_i32_0 = arith.constant 0 : i32
    return %arg0, %c0_i32 : i32, i32
  }
}

module attributes {stable_mosaic.version = 11 : i64} {
  func.func @_flash_attn_kernel(%arg0: i32, %arg1: i32, %arg2: i32, %arg3: i32, %arg4: memref<1x1x8xf32, #tpu.memory_space<vmem>>, %arg5: memref<1x1x8x8xbf16, #tpu.memory_space<vmem>>, %arg6: memref<1x1x8x8xbf16, #tpu.memory_space<vmem>>, %arg7: memref<1x1x8x8xbf16, #tpu.memory_space<vmem>>, %arg8: memref<1x1x8x8xbf16, #tpu.memory_space<vmem>>, %arg9: memref<8x1xf32, #tpu.memory_space<vmem>>, %arg10: memref<8x1xf32, #tpu.memory_space<vmem>>, %arg11: memref<8x8xf32, #tpu.memory_space<vmem>>) attributes {dimension_semantics = [#tpu.dimension_semantics<parallel>, #tpu.dimension_semantics<parallel>, #tpu.dimension_semantics<parallel>, #tpu.dimension_semantics<arbitrary>], iteration_bounds = array<i64: 2, 4, 1, 1>, scalar_prefetch = 0 : i64, scratch_operands = 3 : i64, tpu.core_type = #tpu.core_type<tc>, window_params = [{transform_indices = @transform_0, window_bounds = array<i64: 1, 1, 8>}, {transform_indices = @transform_1, window_bounds = array<i64: 1, 1, 8, 8>}, {transform_indices = @transform_2, window_bounds = array<i64: 1, 1, 8, 8>}, {transform_indices = @transform_3, window_bounds = array<i64: 1, 1, 8, 8>}, {transform_indices = @transform_4, window_bounds = array<i64: 1, 1, 8, 8>}]} {
    %c0_i32 = arith.constant 0 : i32
    %0 = arith.cmpi eq, %arg3, %c0_i32 : i32
    %1 = arith.extui %0 : i1 to i32
    %c0_i32_0 = arith.constant 0 : i32
    %2 = arith.cmpi ne, %1, %c0_i32_0 : i32
    scf.if %2 {
      %cst_34 = arith.constant -1.000000e+30 : f32
      %44 = vector.broadcast %cst_34 : f32 to vector<8x1xf32>
      %c0_35 = arith.constant 0 : index
      %c0_36 = arith.constant 0 : index
      %45 = vector.load %arg9[%c0_35, %c0_36] : memref<8x1xf32, #tpu.memory_space<vmem>>, vector<8x1xf32>
      tpu.vector_store %arg9[%c0_35, %c0_36], %44 {strides = array<i32>} : memref<8x1xf32, #tpu.memory_space<vmem>>, vector<8x1xf32>,
      %cst_37 = arith.constant 0.000000e+00 : f32
      %46 = vector.broadcast %cst_37 : f32 to vector<8x1xf32>
      %c0_38 = arith.constant 0 : index
      %c0_39 = arith.constant 0 : index
      %47 = vector.load %arg10[%c0_38, %c0_39] : memref<8x1xf32, #tpu.memory_space<vmem>>, vector<8x1xf32>
      tpu.vector_store %arg10[%c0_38, %c0_39], %46 {strides = array<i32>} : memref<8x1xf32, #tpu.memory_space<vmem>>, vector<8x1xf32>,
      %cst_40 = arith.constant 0.000000e+00 : f32
      %48 = vector.broadcast %cst_40 : f32 to vector<8x8xf32>
      %c0_41 = arith.constant 0 : index
      %c0_42 = arith.constant 0 : index
      %49 = vector.load %arg11[%c0_41, %c0_42] : memref<8x8xf32, #tpu.memory_space<vmem>>, vector<8x8xf32>
      tpu.vector_store %arg11[%c0_41, %c0_42], %48 {strides = array<i32>} : memref<8x8xf32, #tpu.memory_space<vmem>>, vector<8x8xf32>,
    } else {
    }
    %c0 = arith.constant 0 : index
    %c0_1 = arith.constant 0 : index
    %c0_2 = arith.constant 0 : index
    %c0_3 = arith.constant 0 : index
    %3 = vector.load %arg5[%c0, %c0_1, %c0_2, %c0_3] : memref<1x1x8x8xbf16, #tpu.memory_space<vmem>>, vector<1x1x8x8xbf16>
    %4 = vector.shape_cast %3 : vector<1x1x8x8xbf16> to vector<8x8xbf16>
    %c0_4 = arith.constant 0 : index
    %c0_5 = arith.constant 0 : index
    %c0_6 = arith.constant 0 : index
    %c0_7 = arith.constant 0 : index
    %5 = vector.load %arg6[%c0_4, %c0_5, %c0_6, %c0_7] : memref<1x1x8x8xbf16, #tpu.memory_space<vmem>>, vector<1x1x8x8xbf16>
    %6 = vector.shape_cast %5 : vector<1x1x8x8xbf16> to vector<8x8xbf16>
    %cst = arith.constant dense<0.000000e+00> : vector<8x8xf32>
    %7 = tpu.matmul %4, %6, %cst {dimension_numbers = #tpu.dot_dimension_numbers<[1], [1], [0], [0], [0, 0, 1, 0], [], []>} : vector<8x8xbf16>, vector<8x8xbf16>, vector<8x8xf32> -> vector<8x8xf32>
    %c0_8 = arith.constant 0 : index
    %c0_9 = arith.constant 0 : index
    %c0_10 = arith.constant 0 : index
    %8 = vector.load %arg4[%c0_8, %c0_9, %c0_10] : memref<1x1x8xf32, #tpu.memory_space<vmem>>, vector<1x1x8xf32>
    %9 = vector.shape_cast %8 : vector<1x1x8xf32> to vector<1x8xf32>
    %cst_11 = arith.constant 5.000000e-01 : f32
    %10 = vector.broadcast %cst_11 : f32 to vector<1x8xf32>
    %11 = arith.cmpf ogt, %9, %10 : vector<1x8xf32>
    %cst_12 = arith.constant -1.000000e+09 : f32
    %12 = vector.shape_cast %11 : vector<1x8xi1> to vector<1x8xi1>
    %13 = vector.broadcast %12 : vector<1x8xi1> to vector<8x8xi1>
    %14 = vector.broadcast %cst_12 : f32 to vector<8x8xf32>
    %15 = arith.select %13, %7, %14 : vector<8x8xi1>, vector<8x8xf32>
    %c0_13 = arith.constant 0 : index
    %c0_14 = arith.constant 0 : index
    %16 = vector.load %arg9[%c0_13, %c0_14] : memref<8x1xf32, #tpu.memory_space<vmem>>, vector<8x1xf32>
    %cst_15 = arith.constant dense<0xFF800000> : vector<8xf32>
    %17 = vector.multi_reduction <maximumf>, %15, %cst_15 [1] : vector<8x8xf32> to vector<8xf32>
    %18 = vector.shape_cast %17 : vector<8xf32> to vector<8x1xf32>
    %19 = arith.maximumf %16, %18 : vector<8x1xf32>
    %20 = arith.subf %16, %19 : vector<8x1xf32>
    %21 = math.exp %20 : vector<8x1xf32>
    %22 = vector.broadcast %19 : vector<8x1xf32> to vector<8x8xf32>
    %23 = arith.subf %15, %22 : vector<8x8xf32>
    %24 = math.exp %23 : vector<8x8xf32>
    %c0_16 = arith.constant 0 : index
    %c0_17 = arith.constant 0 : index
    %25 = vector.load %arg10[%c0_16, %c0_17] : memref<8x1xf32, #tpu.memory_space<vmem>>, vector<8x1xf32>
    %26 = arith.mulf %21, %25 : vector<8x1xf32>
    %cst_18 = arith.constant dense<0.000000e+00> : vector<8xf32>
    %27 = vector.multi_reduction <add>, %24, %cst_18 [1] : vector<8x8xf32> to vector<8xf32>
    %28 = vector.shape_cast %27 : vector<8xf32> to vector<8x1xf32>
    %29 = arith.addf %26, %28 : vector<8x1xf32>
    %c0_19 = arith.constant 0 : index
    %c0_20 = arith.constant 0 : index
    %30 = vector.load %arg10[%c0_19, %c0_20] : memref<8x1xf32, #tpu.memory_space<vmem>>, vector<8x1xf32>
    tpu.vector_store %arg10[%c0_19, %c0_20], %29 {strides = array<i32>} : memref<8x1xf32, #tpu.memory_space<vmem>>, vector<8x1xf32>,
    %c0_21 = arith.constant 0 : index
    %c0_22 = arith.constant 0 : index
    %31 = vector.load %arg11[%c0_21, %c0_22] : memref<8x8xf32, #tpu.memory_space<vmem>>, vector<8x8xf32>
    %32 = vector.broadcast %21 : vector<8x1xf32> to vector<8x8xf32>
    %33 = arith.mulf %32, %31 : vector<8x8xf32>
    %34 = arith.truncf %24 : vector<8x8xf32> to vector<8x8xbf16>
    %c0_23 = arith.constant 0 : index
    %c0_24 = arith.constant 0 : index
    %c0_25 = arith.constant 0 : index
    %c0_26 = arith.constant 0 : index
    %35 = vector.load %arg7[%c0_23, %c0_24, %c0_25, %c0_26] : memref<1x1x8x8xbf16, #tpu.memory_space<vmem>>, vector<1x1x8x8xbf16>
    %36 = vector.shape_cast %35 : vector<1x1x8x8xbf16> to vector<8x8xbf16>
    %cst_27 = arith.constant dense<0.000000e+00> : vector<8x8xf32>
    %37 = tpu.matmul %34, %36, %cst_27 {dimension_numbers = #tpu.dot_dimension_numbers<[1], [0], [0], [1], [0, 0, 1, 1], [], []>} : vector<8x8xbf16>, vector<8x8xbf16>, vector<8x8xf32> -> vector<8x8xf32>
    %38 = arith.addf %33, %37 : vector<8x8xf32>
    %c0_28 = arith.constant 0 : index
    %c0_29 = arith.constant 0 : index
    %39 = vector.load %arg11[%c0_28, %c0_29] : memref<8x8xf32, #tpu.memory_space<vmem>>, vector<8x8xf32>
    tpu.vector_store %arg11[%c0_28, %c0_29], %38 {strides = array<i32>} : memref<8x8xf32, #tpu.memory_space<vmem>>, vector<8x8xf32>,
    %c0_30 = arith.constant 0 : index
    %c0_31 = arith.constant 0 : index
    %40 = vector.load %arg9[%c0_30, %c0_31] : memref<8x1xf32, #tpu.memory_space<vmem>>, vector<8x1xf32>
    tpu.vector_store %arg9[%c0_30, %c0_31], %19 {strides = array<i32>} : memref<8x1xf32, #tpu.memory_space<vmem>>, vector<8x1xf32>,
    %c0_i32_32 = arith.constant 0 : i32
    %41 = arith.cmpi eq, %arg3, %c0_i32_32 : i32
    %42 = arith.extui %41 : i1 to i32
    %c0_i32_33 = arith.constant 0 : i32
    %43 = arith.cmpi ne, %42, %c0_i32_33 : i32
    scf.if %43 {
      %c0_34 = arith.constant 0 : index
      %c0_35 = arith.constant 0 : index
      %44 = vector.load %arg11[%c0_34, %c0_35] : memref<8x8xf32, #tpu.memory_space<vmem>>, vector<8x8xf32>
      %c0_36 = arith.constant 0 : index
      %c0_37 = arith.constant 0 : index
      %45 = vector.load %arg10[%c0_36, %c0_37] : memref<8x1xf32, #tpu.memory_space<vmem>>, vector<8x1xf32>
      %46 = tpu.reciprocal %45 {approx = true} : vector<8x1xf32> -> vector<8x1xf32>
      %47 = vector.broadcast %46 : vector<8x1xf32> to vector<8x8xf32>
      %48 = arith.mulf %44, %47 : vector<8x8xf32>
      %49 = arith.truncf %48 : vector<8x8xf32> to vector<8x8xbf16>
      %c0_38 = arith.constant 0 : index
      %c0_39 = arith.constant 0 : index
      %c0_40 = arith.constant 0 : index
      %c0_41 = arith.constant 0 : index
      %50 = vector.load %arg8[%c0_38, %c0_39, %c0_40, %c0_41] : memref<1x1x8x8xbf16, #tpu.memory_space<vmem>>, vector<1x1x8x8xbf16>
      %51 = vector.shape_cast %50 : vector<1x1x8x8xbf16> to vector<8x8xbf16>
      %52 = vector.shape_cast %49 : vector<8x8xbf16> to vector<1x1x8x8xbf16>
      tpu.vector_store %arg8[%c0_38, %c0_39, %c0_40, %c0_41], %52 {strides = array<i32>} : memref<1x1x8x8xbf16, #tpu.memory_space<vmem>>, vector<1x1x8x8xbf16>,
    } else {
    }
    return
  }
  func.func @transform_0(%arg0: i32, %arg1: i32, %arg2: i32, %arg3: i32) -> (i32, i32, i32) {
    %c0_i32 = arith.constant 0 : i32
    %c0_i32_0 = arith.constant 0 : i32
    return %arg0, %c0_i32, %arg3 : i32, i32, i32
  }
  func.func @transform_1(%arg0: i32, %arg1: i32, %arg2: i32, %arg3: i32) -> (i32, i32, i32, i32) {
    %c0_i32 = arith.constant 0 : i32
    %c0_i32_0 = arith.constant 0 : i32
    return %arg0, %arg1, %arg2, %c0_i32 : i32, i32, i32, i32
  }
  func.func @transform_2(%arg0: i32, %arg1: i32, %arg2: i32, %arg3: i32) -> (i32, i32, i32, i32) {
    %c0_i32 = arith.constant 0 : i32
    %c0_i32_0 = arith.constant 0 : i32
    return %arg0, %arg1, %arg3, %c0_i32 : i32, i32, i32, i32
  }
  func.func @transform_3(%arg0: i32, %arg1: i32, %arg2: i32, %arg3: i32) -> (i32, i32, i32, i32) {
    %c0_i32 = arith.constant 0 : i32
    %c0_i32_0 = arith.constant 0 : i32
    return %arg0, %arg1, %arg3, %c0_i32 : i32, i32, i32, i32
  }
  func.func @transform_4(%arg0: i32, %arg1: i32, %arg2: i32, %arg3: i32) -> (i32, i32, i32, i32) {
    %c0_i32 = arith.constant 0 : i32
    %c0_i32_0 = arith.constant 0 : i32
    return %arg0, %arg1, %arg2, %c0_i32 : i32, i32, i32, i32
  }
}

module attributes {stable_mosaic.version = 11 : i64} {
  func.func @_matmul_kernel(%arg0: i32, %arg1: i32, %arg2: i32, %arg3: memref<16x32xbf16, #tpu.memory_space<vmem>>, %arg4: memref<32x64xbf16, #tpu.memory_space<vmem>>, %arg5: memref<1x64xf32, #tpu.memory_space<vmem>>, %arg6: memref<16x64xbf16, #tpu.memory_space<vmem>>, %arg7: memref<16x64xf32, #tpu.memory_space<vmem>>) attributes {dimension_semantics = [#tpu.dimension_semantics<parallel>, #tpu.dimension_semantics<parallel>, #tpu.dimension_semantics<arbitrary>], iteration_bounds = array<i64: 1, 1, 1>, scalar_prefetch = 0 : i64, scratch_operands = 1 : i64, tpu.core_type = #tpu.core_type<tc>, window_params = [{transform_indices = @transform_0, window_bounds = array<i64: 16, 32>}, {transform_indices = @transform_1, window_bounds = array<i64: 32, 64>}, {transform_indices = @transform_2, window_bounds = array<i64: 1, 64>}, {transform_indices = @transform_3, window_bounds = array<i64: 16, 64>}]} {
    %c0_i32 = arith.constant 0 : i32
    %0 = arith.cmpi eq, %arg2, %c0_i32 : i32
    %1 = arith.extui %0 : i1 to i32
    %c0_i32_0 = arith.constant 0 : i32
    %2 = arith.cmpi ne, %1, %c0_i32_0 : i32
    scf.if %2 {
      %cst_10 = arith.constant 0.000000e+00 : f32
      %12 = vector.broadcast %cst_10 : f32 to vector<16x64xf32>
      %c0_11 = arith.constant 0 : index
      %c0_12 = arith.constant 0 : index
      %13 = vector.load %arg7[%c0_11, %c0_12] : memref<16x64xf32, #tpu.memory_space<vmem>>, vector<16x64xf32>
      tpu.vector_store %arg7[%c0_11, %c0_12], %12 {strides = array<i32>} : memref<16x64xf32, #tpu.memory_space<vmem>>, vector<16x64xf32>,
    } else {
    }
    %c0 = arith.constant 0 : index
    %c0_1 = arith.constant 0 : index
    %3 = vector.load %arg3[%c0, %c0_1] : memref<16x32xbf16, #tpu.memory_space<vmem>>, vector<16x32xbf16>
    %c0_2 = arith.constant 0 : index
    %c0_3 = arith.constant 0 : index
    %4 = vector.load %arg4[%c0_2, %c0_3] : memref<32x64xbf16, #tpu.memory_space<vmem>>, vector<32x64xbf16>
    %c0_4 = arith.constant 0 : index
    %c0_5 = arith.constant 0 : index
    %5 = vector.load %arg7[%c0_4, %c0_5] : memref<16x64xf32, #tpu.memory_space<vmem>>, vector<16x64xf32>
    %cst = arith.constant dense<0.000000e+00> : vector<16x64xf32>
    %6 = tpu.matmul %3, %4, %cst {dimension_numbers = #tpu.dot_dimension_numbers<[1], [0], [0], [1], [0, 0, 1, 1], [], []>} : vector<16x32xbf16>, vector<32x64xbf16>, vector<16x64xf32> -> vector<16x64xf32>
    %7 = arith.addf %5, %6 : vector<16x64xf32>
    %c0_6 = arith.constant 0 : index
    %c0_7 = arith.constant 0 : index
    %8 = vector.load %arg7[%c0_6, %c0_7] : memref<16x64xf32, #tpu.memory_space<vmem>>, vector<16x64xf32>
    tpu.vector_store %arg7[%c0_6, %c0_7], %7 {strides = array<i32>} : memref<16x64xf32, #tpu.memory_space<vmem>>, vector<16x64xf32>,
    %c0_i32_8 = arith.constant 0 : i32
    %9 = arith.cmpi eq, %arg2, %c0_i32_8 : i32
    %10 = arith.extui %9 : i1 to i32
    %c0_i32_9 = arith.constant 0 : i32
    %11 = arith.cmpi ne, %10, %c0_i32_9 : i32
    scf.if %11 {
      %c0_10 = arith.constant 0 : index
      %c0_11 = arith.constant 0 : index
      %12 = vector.load %arg7[%c0_10, %c0_11] : memref<16x64xf32, #tpu.memory_space<vmem>>, vector<16x64xf32>
      %c0_12 = arith.constant 0 : index
      %c0_13 = arith.constant 0 : index
      %13 = vector.load %arg5[%c0_12, %c0_13] : memref<1x64xf32, #tpu.memory_space<vmem>>, vector<1x64xf32>
      %14 = vector.broadcast %13 : vector<1x64xf32> to vector<16x64xf32>
      %15 = arith.addf %12, %14 : vector<16x64xf32>
      %16 = arith.truncf %15 : vector<16x64xf32> to vector<16x64xbf16>
      %c0_14 = arith.constant 0 : index
      %c0_15 = arith.constant 0 : index
      %17 = vector.load %arg6[%c0_14, %c0_15] : memref<16x64xbf16, #tpu.memory_space<vmem>>, vector<16x64xbf16>
      tpu.vector_store %arg6[%c0_14, %c0_15], %16 {strides = array<i32>} : memref<16x64xbf16, #tpu.memory_space<vmem>>, vector<16x64xbf16>,
    } else {
    }
    return
  }
  func.func @transform_0(%arg0: i32, %arg1: i32, %arg2: i32) -> (i32, i32) {
    %c0_i32 = arith.constant 0 : i32
    return %arg0, %arg2 : i32, i32
  }
  func.func @transform_1(%arg0: i32, %arg1: i32, %arg2: i32) -> (i32, i32) {
    %c0_i32 = arith.constant 0 : i32
    return %arg2, %arg1 : i32, i32
  }
  func.func @transform_2(%arg0: i32, %arg1: i32, %arg2: i32) -> (i32, i32) {
    %c0_i32 = arith.constant 0 : i32
    %c0_i32_0 = arith.constant 0 : i32
    return %c0_i32, %arg1 : i32, i32
  }
  func.func @transform_3(%arg0: i32, %arg1: i32, %arg2: i32) -> (i32, i32) {
    %c0_i32 = arith.constant 0 : i32
    return %arg0, %arg1 : i32, i32
  }
}

module attributes {stable_mosaic.version = 11 : i64} {
  func.func @_ffn_res_ln_kernel(%arg0: i32, %arg1: i32, %arg2: memref<16x32xbf16, #tpu.memory_space<vmem>>, %arg3: memref<32x64xbf16, #tpu.memory_space<vmem>>, %arg4: memref<1x64xf32, #tpu.memory_space<vmem>>, %arg5: memref<64x32xbf16, #tpu.memory_space<vmem>>, %arg6: memref<1x32xf32, #tpu.memory_space<vmem>>, %arg7: memref<1x32xf32, #tpu.memory_space<vmem>>, %arg8: memref<1x32xf32, #tpu.memory_space<vmem>>, %arg9: memref<16x32xbf16, #tpu.memory_space<vmem>>, %arg10: memref<16x32xf32, #tpu.memory_space<vmem>>) attributes {dimension_semantics = [#tpu.dimension_semantics<parallel>, #tpu.dimension_semantics<arbitrary>], iteration_bounds = array<i64: 1, 1>, scalar_prefetch = 0 : i64, scratch_operands = 1 : i64, tpu.core_type = #tpu.core_type<tc>, window_params = [{transform_indices = @transform_0, window_bounds = array<i64: 16, 32>}, {transform_indices = @transform_1, window_bounds = array<i64: 32, 64>}, {transform_indices = @transform_2, window_bounds = array<i64: 1, 64>}, {transform_indices = @transform_3, window_bounds = array<i64: 64, 32>}, {pipeline_mode = #tpu.pipeline_mode<synchronous>, transform_indices = @transform_4, window_bounds = array<i64: 1, 32>}, {pipeline_mode = #tpu.pipeline_mode<synchronous>, transform_indices = @transform_5, window_bounds = array<i64: 1, 32>}, {pipeline_mode = #tpu.pipeline_mode<synchronous>, transform_indices = @transform_6, window_bounds = array<i64: 1, 32>}, {transform_indices = @transform_7, window_bounds = array<i64: 16, 32>}]} {
    %c0_i32 = arith.constant 0 : i32
    %0 = arith.cmpi eq, %arg1, %c0_i32 : i32
    %1 = arith.extui %0 : i1 to i32
    %c0_i32_0 = arith.constant 0 : i32
    %2 = arith.cmpi ne, %1, %c0_i32_0 : i32
    scf.if %2 {
      %cst_16 = arith.constant 0.000000e+00 : f32
      %20 = vector.broadcast %cst_16 : f32 to vector<16x32xf32>
      %c0_17 = arith.constant 0 : index
      %c0_18 = arith.constant 0 : index
      %21 = vector.load %arg10[%c0_17, %c0_18] : memref<16x32xf32, #tpu.memory_space<vmem>>, vector<16x32xf32>
      tpu.vector_store %arg10[%c0_17, %c0_18], %20 {strides = array<i32>} : memref<16x32xf32, #tpu.memory_space<vmem>>, vector<16x32xf32>,
    } else {
    }
    %c0 = arith.constant 0 : index
    %c0_1 = arith.constant 0 : index
    %3 = vector.load %arg2[%c0, %c0_1] : memref<16x32xbf16, #tpu.memory_space<vmem>>, vector<16x32xbf16>
    %c0_2 = arith.constant 0 : index
    %c0_3 = arith.constant 0 : index
    %4 = vector.load %arg3[%c0_2, %c0_3] : memref<32x64xbf16, #tpu.memory_space<vmem>>, vector<32x64xbf16>
    %cst = arith.constant dense<0.000000e+00> : vector<16x64xf32>
    %5 = tpu.matmul %3, %4, %cst {dimension_numbers = #tpu.dot_dimension_numbers<[1], [0], [0], [1], [0, 0, 1, 1], [], []>} : vector<16x32xbf16>, vector<32x64xbf16>, vector<16x64xf32> -> vector<16x64xf32>
    %c0_4 = arith.constant 0 : index
    %c0_5 = arith.constant 0 : index
    %6 = vector.load %arg4[%c0_4, %c0_5] : memref<1x64xf32, #tpu.memory_space<vmem>>, vector<1x64xf32>
    %7 = vector.broadcast %6 : vector<1x64xf32> to vector<16x64xf32>
    %8 = arith.addf %5, %7 : vector<16x64xf32>
    %cst_6 = arith.constant 0.000000e+00 : f32
    %9 = vector.broadcast %cst_6 : f32 to vector<16x64xf32>
    %10 = arith.maximumf %8, %9 : vector<16x64xf32>
    %c0_7 = arith.constant 0 : index
    %c0_8 = arith.constant 0 : index
    %11 = vector.load %arg10[%c0_7, %c0_8] : memref<16x32xf32, #tpu.memory_space<vmem>>, vector<16x32xf32>
    %12 = arith.truncf %10 : vector<16x64xf32> to vector<16x64xbf16>
    %c0_9 = arith.constant 0 : index
    %c0_10 = arith.constant 0 : index
    %13 = vector.load %arg5[%c0_9, %c0_10] : memref<64x32xbf16, #tpu.memory_space<vmem>>, vector<64x32xbf16>
    %cst_11 = arith.constant dense<0.000000e+00> : vector<16x32xf32>
    %14 = tpu.matmul %12, %13, %cst_11 {dimension_numbers = #tpu.dot_dimension_numbers<[1], [0], [0], [1], [0, 0, 1, 1], [], []>} : vector<16x64xbf16>, vector<64x32xbf16>, vector<16x32xf32> -> vector<16x32xf32>
    %15 = arith.addf %11, %14 : vector<16x32xf32>
    %c0_12 = arith.constant 0 : index
    %c0_13 = arith.constant 0 : index
    %16 = vector.load %arg10[%c0_12, %c0_13] : memref<16x32xf32, #tpu.memory_space<vmem>>, vector<16x32xf32>
    tpu.vector_store %arg10[%c0_12, %c0_13], %15 {strides = array<i32>} : memref<16x32xf32, #tpu.memory_space<vmem>>, vector<16x32xf32>,
    %c0_i32_14 = arith.constant 0 : i32
    %17 = arith.cmpi eq, %arg1, %c0_i32_14 : i32
    %18 = arith.extui %17 : i1 to i32
    %c0_i32_15 = arith.constant 0 : i32
    %19 = arith.cmpi ne, %18, %c0_i32_15 : i32
    scf.if %19 {
      %c0_16 = arith.constant 0 : index
      %c0_17 = arith.constant 0 : index
      %20 = vector.load %arg10[%c0_16, %c0_17] : memref<16x32xf32, #tpu.memory_space<vmem>>, vector<16x32xf32>
      %c0_18 = arith.constant 0 : index
      %c0_19 = arith.constant 0 : index
      %21 = vector.load %arg6[%c0_18, %c0_19] : memref<1x32xf32, #tpu.memory_space<vmem>>, vector<1x32xf32>
      %22 = vector.broadcast %21 : vector<1x32xf32> to vector<16x32xf32>
      %23 = arith.addf %20, %22 : vector<16x32xf32>
      %24 = arith.extf %3 : vector<16x32xbf16> to vector<16x32xf32>
      %25 = arith.addf %23, %24 : vector<16x32xf32>
      %cst_20 = arith.constant dense<0.000000e+00> : vector<16xf32>
      %26 = vector.multi_reduction <add>, %25, %cst_20 [1] : vector<16x32xf32> to vector<16xf32>
      %27 = vector.shape_cast %26 : vector<16xf32> to vector<16x1xf32>
      %cst_21 = arith.constant 3.200000e+01 : f32
      %28 = vector.broadcast %cst_21 : f32 to vector<16x1xf32>
      %29 = arith.divf %27, %28 : vector<16x1xf32>
      %30 = vector.broadcast %29 : vector<16x1xf32> to vector<16x32xf32>
      %31 = arith.subf %25, %30 : vector<16x32xf32>
      %32 = arith.mulf %31, %31 : vector<16x32xf32>
      %cst_22 = arith.constant dense<0.000000e+00> : vector<16xf32>
      %33 = vector.multi_reduction <add>, %32, %cst_22 [1] : vector<16x32xf32> to vector<16xf32>
      %34 = vector.shape_cast %33 : vector<16xf32> to vector<16x1xf32>
      %cst_23 = arith.constant 3.200000e+01 : f32
      %35 = vector.broadcast %cst_23 : f32 to vector<16x1xf32>
      %36 = arith.divf %34, %35 : vector<16x1xf32>
      %37 = vector.broadcast %29 : vector<16x1xf32> to vector<16x32xf32>
      %38 = arith.subf %25, %37 : vector<16x32xf32>
      %cst_24 = arith.constant 9.99999974E-6 : f32
      %39 = vector.broadcast %cst_24 : f32 to vector<16x1xf32>
      %40 = arith.addf %36, %39 : vector<16x1xf32>
      %41 = math.rsqrt %40 : vector<16x1xf32>
      %42 = vector.broadcast %41 : vector<16x1xf32> to vector<16x32xf32>
      %43 = arith.mulf %38, %42 : vector<16x32xf32>
      %c0_25 = arith.constant 0 : index
      %c0_26 = arith.constant 0 : index
      %44 = vector.load %arg7[%c0_25, %c0_26] : memref<1x32xf32, #tpu.memory_space<vmem>>, vector<1x32xf32>
      %45 = vector.broadcast %44 : vector<1x32xf32> to vector<16x32xf32>
      %46 = arith.mulf %43, %45 : vector<16x32xf32>
      %c0_27 = arith.constant 0 : index
      %c0_28 = arith.constant 0 : index
      %47 = vector.load %arg8[%c0_27, %c0_28] : memref<1x32xf32, #tpu.memory_space<vmem>>, vector<1x32xf32>
      %48 = vector.broadcast %47 : vector<1x32xf32> to vector<16x32xf32>
      %49 = arith.addf %46, %48 : vector<16x32xf32>
      %50 = arith.truncf %49 : vector<16x32xf32> to vector<16x32xbf16>
      %c0_29 = arith.constant 0 : index
      %c0_30 = arith.constant 0 : index
      %51 = vector.load %arg9[%c0_29, %c0_30] : memref<16x32xbf16, #tpu.memory_space<vmem>>, vector<16x32xbf16>
      tpu.vector_store %arg9[%c0_29, %c0_30], %50 {strides = array<i32>} : memref<16x32xbf16, #tpu.memory_space<vmem>>, vector<16x32xbf16>,
    } else {
    }
    return
  }
  func.func @transform_0(%arg0: i32, %arg1: i32) -> (i32, i32) {
    %c0_i32 = arith.constant 0 : i32
    %c0_i32_0 = arith.constant 0 : i32
    return %arg0, %c0_i32 : i32, i32
  }
  func.func @transform_1(%arg0: i32, %arg1: i32) -> (i32, i32) {
    %c0_i32 = arith.constant 0 : i32
    %c0_i32_0 = arith.constant 0 : i32
    return %c0_i32, %arg1 : i32, i32
  }
  func.func @transform_2(%arg0: i32, %arg1: i32) -> (i32, i32) {
    %c0_i32 = arith.constant 0 : i32
    %c0_i32_0 = arith.constant 0 : i32
    return %c0_i32, %arg1 : i32, i32
  }
  func.func @transform_3(%arg0: i32, %arg1: i32) -> (i32, i32) {
    %c0_i32 = arith.constant 0 : i32
    %c0_i32_0 = arith.constant 0 : i32
    return %arg1, %c0_i32 : i32, i32
  }
  func.func @transform_4(%arg0: i32, %arg1: i32) -> (i32, i32) {
    %c0_i32 = arith.constant 0 : i32
    %c0_i32_0 = arith.constant 0 : i32
    %c0_i32_1 = arith.constant 0 : i32
    return %c0_i32, %c0_i32_0 : i32, i32
  }
  func.func @transform_5(%arg0: i32, %arg1: i32) -> (i32, i32) {
    %c0_i32 = arith.constant 0 : i32
    %c0_i32_0 = arith.constant 0 : i32
    %c0_i32_1 = arith.constant 0 : i32
    return %c0_i32, %c0_i32_0 : i32, i32
  }
  func.func @transform_6(%arg0: i32, %arg1: i32) -> (i32, i32) {
    %c0_i32 = arith.constant 0 : i32
    %c0_i32_0 = arith.constant 0 : i32
    %c0_i32_1 = arith.constant 0 : i32
    return %c0_i32, %c0_i32_0 : i32, i32
  }
  func.func @transform_7(%arg0: i32, %arg1: i32) -> (i32, i32) {
    %c0_i32 = arith.constant 0 : i32
    %c0_i32_0 = arith.constant 0 : i32
    return %arg0, %c0_i32 : i32, i32
  }
}

module attributes {stable_mosaic.version = 11 : i64} {
  func.func @_matmul_kernel(%arg0: i32, %arg1: i32, %arg2: i32, %arg3: memref<16x32xbf16, #tpu.memory_space<vmem>>, %arg4: memref<64x32xf32, #tpu.memory_space<vmem>>, %arg5: memref<16x64xf32, #tpu.memory_space<vmem>>, %arg6: memref<16x64xf32, #tpu.memory_space<vmem>>) attributes {dimension_semantics = [#tpu.dimension_semantics<parallel>, #tpu.dimension_semantics<parallel>, #tpu.dimension_semantics<arbitrary>], iteration_bounds = array<i64: 1, 1, 1>, scalar_prefetch = 0 : i64, scratch_operands = 1 : i64, tpu.core_type = #tpu.core_type<tc>, window_params = [{transform_indices = @transform_0, window_bounds = array<i64: 16, 32>}, {transform_indices = @transform_1, window_bounds = array<i64: 64, 32>}, {transform_indices = @transform_2, window_bounds = array<i64: 16, 64>}]} {
    %c0_i32 = arith.constant 0 : i32
    %0 = arith.cmpi eq, %arg2, %c0_i32 : i32
    %1 = arith.extui %0 : i1 to i32
    %c0_i32_0 = arith.constant 0 : i32
    %2 = arith.cmpi ne, %1, %c0_i32_0 : i32
    scf.if %2 {
      %cst_10 = arith.constant 0.000000e+00 : f32
      %13 = vector.broadcast %cst_10 : f32 to vector<16x64xf32>
      %c0_11 = arith.constant 0 : index
      %c0_12 = arith.constant 0 : index
      %14 = vector.load %arg6[%c0_11, %c0_12] : memref<16x64xf32, #tpu.memory_space<vmem>>, vector<16x64xf32>
      tpu.vector_store %arg6[%c0_11, %c0_12], %13 {strides = array<i32>} : memref<16x64xf32, #tpu.memory_space<vmem>>, vector<16x64xf32>,
    } else {
    }
    %c0 = arith.constant 0 : index
    %c0_1 = arith.constant 0 : index
    %3 = vector.load %arg3[%c0, %c0_1] : memref<16x32xbf16, #tpu.memory_space<vmem>>, vector<16x32xbf16>
    %c0_2 = arith.constant 0 : index
    %c0_3 = arith.constant 0 : index
    %4 = vector.load %arg4[%c0_2, %c0_3] : memref<64x32xf32, #tpu.memory_space<vmem>>, vector<64x32xf32>
    %5 = arith.truncf %4 : vector<64x32xf32> to vector<64x32xbf16>
    %c0_4 = arith.constant 0 : index
    %c0_5 = arith.constant 0 : index
    %6 = vector.load %arg6[%c0_4, %c0_5] : memref<16x64xf32, #tpu.memory_space<vmem>>, vector<16x64xf32>
    %cst = arith.constant dense<0.000000e+00> : vector<16x64xf32>
    %7 = tpu.matmul %3, %5, %cst {dimension_numbers = #tpu.dot_dimension_numbers<[1], [1], [0], [0], [0, 0, 1, 0], [], []>} : vector<16x32xbf16>, vector<64x32xbf16>, vector<16x64xf32> -> vector<16x64xf32>
    %8 = arith.addf %6, %7 : vector<16x64xf32>
    %c0_6 = arith.constant 0 : index
    %c0_7 = arith.constant 0 : index
    %9 = vector.load %arg6[%c0_6, %c0_7] : memref<16x64xf32, #tpu.memory_space<vmem>>, vector<16x64xf32>
    tpu.vector_store %arg6[%c0_6, %c0_7], %8 {strides = array<i32>} : memref<16x64xf32, #tpu.memory_space<vmem>>, vector<16x64xf32>,
    %c0_i32_8 = arith.constant 0 : i32
    %10 = arith.cmpi eq, %arg2, %c0_i32_8 : i32
    %11 = arith.extui %10 : i1 to i32
    %c0_i32_9 = arith.constant 0 : i32
    %12 = arith.cmpi ne, %11, %c0_i32_9 : i32
    scf.if %12 {
      %c0_10 = arith.constant 0 : index
      %c0_11 = arith.constant 0 : index
      %13 = vector.load %arg6[%c0_10, %c0_11] : memref<16x64xf32, #tpu.memory_space<vmem>>, vector<16x64xf32>
      %c0_12 = arith.constant 0 : index
      %c0_13 = arith.constant 0 : index
      %14 = vector.load %arg5[%c0_12, %c0_13] : memref<16x64xf32, #tpu.memory_space<vmem>>, vector<16x64xf32>
      tpu.vector_store %arg5[%c0_12, %c0_13], %13 {strides = array<i32>} : memref<16x64xf32, #tpu.memory_space<vmem>>, vector<16x64xf32>,
    } else {
    }
    return
  }
  func.func @transform_0(%arg0: i32, %arg1: i32, %arg2: i32) -> (i32, i32) {
    %c0_i32 = arith.constant 0 : i32
    return %arg0, %arg2 : i32, i32
  }
  func.func @transform_1(%arg0: i32, %arg1: i32, %arg2: i32) -> (i32, i32) {
    %c0_i32 = arith.constant 0 : i32
    return %arg1, %arg2 : i32, i32
  }
  func.func @transform_2(%arg0: i32, %arg1: i32, %arg2: i32) -> (i32, i32) {
    %c0_i32 = arith.constant 0 : i32
    return %arg0, %arg1 : i32, i32
  }
}

</mosaic_0001>

<bundles_post_ra>
// kernel: transformer_forward.33
= control target key start
LH: loop header
LB: loop body
LE: loop exit
PB: predicated region body
PF: predicated region fallthrough
CT: control target
= control target key end

     0   :  { %vm19_vm0 = vcmask 785408   ;;  %v108_v1 = vmov 0.0   ;;  %vm47_vm1 = vcmask 261120   ;;  %vm83_vm2 = vcmask 781312   ;;  %s151_s1 = inlined_call_operand.vmem [shape: bf16[32,96], index: 1, kind: input, shape index: {}]   ;;  %s152_s2 = inlined_call_operand.vmem [shape: f32[1,96], index: 2, kind: input, shape index: {}]   ;;  %s153_s0 = inlined_call_operand.vmem [shape: bf16[16,32], index: 0, kind: input, shape index: {}]   ;;  %s154_s3 = inlined_call_operand.vmem [shape: bf16[16,96], index: 3, kind: output, shape index: {}]  }
   0x1   :  { %v105_v0 = vld [vmem:[%s151_s1 + $0x8] sm:$0xff]  ;;  %20 = vst.msk [vmem:[#allocation2] sm:$0xff] %vm19_vm0, %v108_v1  ;;  %v104_v2 = vld [vmem:[%s151_s1] sm:$0xff] }
   0x2   :  { %21 = vst.msk [vmem:[#allocation2 + $0x8] sm:$0xff] %vm19_vm0, %v108_v1  ;;  %57 = vmatpush.bf16.msra.mxu0 %v105_v0  ;;  %v103_v3 = vld [vmem:[%s153_s0] sm:$0xff] }
   0x3   :  { %v107_v8 = vld [vmem:[%s152_s2] ss:$0 sm:$0xff] }
   0x6   :  { %58 = vmatpush.bf16.msra.mxu0 %v104_v2 }
   0x8   :  { %v28_v4 = vld [vmem:[#allocation2] sm:$0xff] }
   0x9   :  { %102 = vmatmul.msk.bf16.vlgmr.msra.gmra.mxu0 %vm47_vm1, %v103_v3  ;;  %v29_v7 = vld [vmem:[#allocation2 + $0x8] sm:$0xff] }
  0x86   :  { %v60_v5 = vpop.f32.mrf.mxu0 }
  0x87   :  { %v65_v6 = vadd.f32 %v60_v5, %v28_v4 }
  0x89   :  { %68 = vst.msk [vmem:[#allocation2] sm:$0xff] %vm19_vm0, %v65_v6 }
  0x8e   :  { %v62_v9 = vpop.f32.mrf.mxu0 }
  0x8f   :  { %v66_v10 = vadd.f32 %v62_v9, %v29_v7 }
  0x90   :  { %v73_v11 = vld [vmem:[#allocation2] sm:$0xff] }
  0x91   :  { %v79_v12 = vadd.f32 %v107_v8, %v73_v11  ;;  %69 = vst.msk [vmem:[#allocation2 + $0x8] sm:$0xff] %vm19_vm0, %v66_v10 }
  0x93   :  { %v81_v13 = vpack.c.bf16 %v79_v12, %v79_v12 }
  0x95   :  { %84 = vst.msk [vmem:[%s154_s3] sm:$0xf] %vm83_vm2, %v81_v13 }
  0x98   :  { %v74_v14 = vld [vmem:[#allocation2 + $0x8] sm:$0xff] }
  0x99   :  { %v80_v15 = vadd.f32 %v107_v8, %v74_v14 }
  0x9b   :  { %v82_v16 = vpack.c.bf16 %v80_v15, %v80_v15 }
  0x9d   :  { %85 = vst.msk [vmem:[%s154_s3 + $0x4] sm:$0xf] %vm83_vm2, %v82_v16 }

// kernel: transformer_forward.36
= control target key start
LH: loop header
LB: loop body
LE: loop exit
PB: predicated region body
PF: predicated region fallthrough
CT: control target
= control target key end

     0   :  { %vm19_vm0 = vcmask 261120   ;;  %v107_v1 = vmov 0.0   ;;  %vm82_vm1 = vcmask 257024   ;;  %s151_s1 = inlined_call_operand.vmem [shape: bf16[32,32], index: 1, kind: input, shape index: {}]   ;;  %s152_s2 = inlined_call_operand.vmem [shape: f32[1,32], index: 2, kind: input, shape index: {}]   ;;  %s153_s0 = inlined_call_operand.vmem [shape: bf16[16,32], index: 0, kind: input, shape index: {}]   ;;  %s154_s3 = inlined_call_operand.vmem [shape: bf16[16,32], index: 3, kind: output, shape index: {}]  }
   0x1   :  { %v104_v0 = vld [vmem:[%s151_s1 + $0x8] sm:$0xff]  ;;  %20 = vst.msk [vmem:[#allocation2] sm:$0xff] %vm19_vm0, %v107_v1  ;;  %v103_v2 = vld [vmem:[%s151_s1] sm:$0xff] }
   0x2   :  { %21 = vst.msk [vmem:[#allocation2 + $0x8] sm:$0xff] %vm19_vm0, %v107_v1  ;;  %57 = vmatpush.bf16.msra.mxu0 %v104_v0  ;;  %v102_v3 = vld [vmem:[%s153_s0] sm:$0xff] }
   0x3   :  { %v106_v8 = vld [vmem:[%s152_s2] ss:$0 sm:$0xff] }
   0x6   :  { %58 = vmatpush.bf16.msra.mxu0 %v103_v2 }
   0x8   :  { %v28_v4 = vld [vmem:[#allocation2] sm:$0xff] }
   0x9   :  { %101 = vmatmul.msk.bf16.vlgmr.msra.gmra.mxu0 %vm19_vm0, %v102_v3  ;;  %v29_v7 = vld [vmem:[#allocation2 + $0x8] sm:$0xff] }
  0x86   :  { %v60_v5 = vpop.f32.mrf.mxu0 }
  0x87   :  { %v65_v6 = vadd.f32 %v60_v5, %v28_v4 }
  0x89   :  { %67 = vst.msk [vmem:[#allocation2] sm:$0xff] %vm19_vm0, %v65_v6 }
  0x8e   :  { %v62_v9 = vpop.f32.mrf.mxu0 }
  0x8f   :  { %v66_v10 = vadd.f32 %v62_v9, %v29_v7 }
  0x90   :  { %v72_v11 = vld [vmem:[#allocation2] sm:$0xff] }
  0x91   :  { %v78_v12 = vadd.f32 %v106_v8, %v72_v11  ;;  %68 = vst.msk [vmem:[#allocation2 + $0x8] sm:$0xff] %vm19_vm0, %v66_v10 }
  0x93   :  { %v80_v13 = vpack.c.bf16 %v78_v12, %v78_v12 }
  0x95   :  { %83 = vst.msk [vmem:[%s154_s3] sm:$0xf] %vm82_vm1, %v80_v13 }
  0x98   :  { %v73_v14 = vld [vmem:[#allocation2 + $0x8] sm:$0xff] }
  0x99   :  { %v79_v15 = vadd.f32 %v106_v8, %v73_v14 }
  0x9b   :  { %v81_v16 = vpack.c.bf16 %v79_v15, %v79_v15 }
  0x9d   :  { %84 = vst.msk [vmem:[%s154_s3 + $0x4] sm:$0xf] %vm82_vm1, %v81_v16 }

// kernel: transformer_forward.34
= control target key start
LH: loop header
LB: loop body
LE: loop exit
PB: predicated region body
PF: predicated region fallthrough
CT: control target
= control target key end

     0   :  { %s788_s15 = smov 0   ;;  %s790_s16 = smov 0   ;;  %s865_s0 = inlined_call_operand.vmem [shape: f32[2,1,8], index: 0, kind: input, shape index: {}]   ;;  %s866_s1 = inlined_call_operand.vmem [shape: bf16[2,4,8,8], index: 1, kind: input, shape index: {}]   ;;  %s867_s2 = inlined_call_operand.vmem [shape: bf16[2,4,8,8], index: 2, kind: input, shape index: {}]   ;;  %s868_s3 = inlined_call_operand.vmem [shape: bf16[2,4,8,8], index: 3, kind: input, shape index: {}]   ;;  %s869_s4 = inlined_call_operand.vmem [shape: bf16[2,4,8,8], index: 4, kind: output, shape index: {}]  }
   0x1   :  { %s792_s17 = smov 0   ;;  %s794_s18 = smov 0  }
   0x2   :  { %s796_s19 = smov 0  }
   0x3 LB: > { %s36_s20 = sadd.s32 1, %s750_s17  ;;  %s40_s21 = sadd.s32 1, %s754_s18  ;;  %s758_s19 = sphi %s796_s19, %s14_s19   ;;  %s754_s18 = sphi %s794_s18, %s873_s18   ;;  %s750_s17 = sphi %s792_s17, %s872_s17   ;;  %s746_s16 = sphi %s790_s16, %s871_s16   ;;  %s742_s15 = sphi %s788_s15, %s870_s15  }
   0x4   : > { %p38_p0 = scmp.ge.s32.totalorder %s36_s20, 4  ;;  %p655_p1 = scmp.ge.s32.totalorder %s758_s19, 1 }
   0x5   : > { %p255_p2 = scmp.lt.s32.totalorder %s758_s19, 9 }
   0x6   : > { %s875_s20 = smov (%p38_p0, %s36_s20), 0  ;;  %s877_s21 = smov (!%p38_p0, %s40_s21), %s754_s18 }
   0x7   : > { %p256_p3 = pnand %p655_p1, %p255_p2  ;;  %p42_p4 = scmp.ge.s32.totalorder %s877_s21, 2 }
   0x8   : > { %p321_p5 = scmp.lt.s32.totalorder (!%p256_p3), %s746_s16, 1  ;;  %p329_p6 = scmp.lt.s32.totalorder (!%p256_p3), %s742_s15, 3 }
   0x9   : > { %s879_s21 = smov (%p42_p4, %s877_s21), 0  ;;  %259 = sbr.rel (%p256_p3) target bundleno = 630 (0x276), region = 36 }
   0xe   : > { %s881_s16 = smov (!%p321_p5, %s746_s16), 1  ;;  %s883_s15 = smov (!%p329_p6, %s742_s15), 3  ;;  %vm379_vm0 = vcmask 64512   ;;  %v760_v3 = vmov 0   ;;  %vm376_vm1 = vcmask 7168   ;;  %v406_v6 = vlaneseq }
   0xf   : > { %s656_s22 = sshll.u32 %s881_s16, 2  ;;  %711 = vset.pattern.permute.xlu0 %v760_v3  ;;  %712 = vset.pattern.permute.xlu1 %v760_v3  ;;  %v761_v4 = vmov -1e+30   ;;  %s326_s7 = scalar_lea.vmem %s865_s0, %s881_s16  ;;  %v762_v15 = vmov 0.0   ;;  %vm457_vm6 = vcmask 1043456   ;;  %vm490_vm7 = vcmask 60416  }
  0x10   : > { %s335_s23 = sadd.s32 %s656_s22, %s883_s15  ;;  %713 = vset.pattern.permute.xlu2 %v760_v3  ;;  %377 = vst.msk [vmem:[#allocation2] sm:$0xff] %vm376_vm1, %v761_v4  ;;  %v403_v5 = vld [vmem:[%s326_s7] sm:$0x1]  ;;  %v407_v8 = vshrl.u32 %v406_v6, 7  ;;  %v412_v9 = vand.u32 127, %v406_v6 }
  0x11   : > { %s818_s24 = sshll.u32 %s335_s23, 2  ;;  %vm404_vm2 = vcmp.gt.f32.partialorder %v403_v5, 0.5  ;;  %378 = vst.msk [vmem:[#allocation3] sm:$0xff] %vm376_vm1, %v762_v15 }
  0x12   : > { %s348_s27 = scalar_lea.vmem %s867_s2, %s818_s24  ;;  %s337_s30 = scalar_lea.vmem %s866_s1, %s818_s24  ;;  %v416_v7 = vsel %vm404_vm2, 1, %v760_v3  ;;  %vm415_vm3 = vcmp.le.s32.totalorder %v412_v9, %v407_v8  ;;  %380 = vst.msk [vmem:[#allocation4] sm:$0xff] %vm379_vm0, %v762_v15 }
  0x13   : > { %v382_v0 = vld [vmem:[%s348_s27] sm:$0xf]  ;;  %v417_v10 = vperm.slane %v416_v7, 0  ;;  %s359_s10 = scalar_lea.vmem %s868_s3, %s818_s24  ;;  %s370_s13 = scalar_lea.vmem %s869_s4, %s818_s24 }
  0x14   : > { %v388_v1 = vsel %vm379_vm0, %v382_v0, 0  ;;  %v381_v2 = vld [vmem:[%s337_s30] sm:$0xf] }
  0x15   : > { %397 = vmatpush.bf16.xpose.msra.mxu0 %v388_v1  ;;  %vm418_vm4 = vcmp.eq.s32.totalorder %v417_v10, 1  ;;  %v453_v20 = vld [vmem:[%s359_s10] sm:$0xf] }
  0x16   : > { %vm419_vm5 = vmand %vm418_vm4, %vm415_vm3  ;;  %v459_v21 = vsel %vm457_vm6, %v453_v20, 0 }
  0x17   : > { %v421_v16 = vld [vmem:[#allocation2] sm:$0xff]  ;;  %468 = vmatpush.bf16.msra.mxu1 %v459_v21 }
  0x18   : > { %v437_v30 = vld [vmem:[#allocation3] sm:$0xff] }
  0x19   : > { %v445_v38 = vld [vmem:[#allocation4] sm:$0xff] }
  0x1c   : > { %664 = vmatmul.msk.bf16.vlgmr.msra.gmra.mxu0 %vm379_vm0, %v381_v2 }
  0x99   : > { %v399_v11 = vpop.f32.mrf.mxu0 }
  0x9a   : > { %v420_v12 = vsel %vm419_vm5, %v399_v11, -1e+09 }
  0x9b   : > { %v422_v13 = vsel %vm379_vm0, %v420_v12, -inf }
  0x9c   : > { %423 = vmax.xlane.f32.xlu0 %v422_v13 }
  0xa1   : > { %v401_v14 = vpop.f32.mrf.mxu0 }
 0x10f   : > { %v424_v17 = vpop.xlane.xlu0 %423 }
 0x110   : > { %v425_v18 = vmax.f32 %v421_v16, %v424_v17 }
 0x112   : > { %v426_v19 = vsub.f32 %v421_v16, %v425_v18  ;;  %476 = vst.msk [vmem:[#allocation2] sm:$0xff] %vm376_vm1, %v425_v18  ;;  %431 = vperm.xlu0 %711, %v425_v18  }
 0x114   : > { %v427_v28 = vmul.f32 1.442695, %v426_v19 }
 0x184   : > { %v432_v22 = vpop.permute.xlu0 %431 }
 0x185   : > { %v434_v23 = vsub.f32 %v420_v12, %v432_v22 }
 0x187   : > { %v435_v24 = vmul.f32 1.442695, %v434_v23 }
 0x189   : > { %714 = vpow2.f32 %v435_v24 }
 0x18a   : > { %716 = vpow2.f32 %v427_v28 }
 0x18f   : > { %v715_v25 = vpop.eup %714 }
 0x190   : > { %v439_v26 = vsel %vm379_vm0, %v715_v25, 0.0  ;;  %v452_v27 = vpack.c.bf16 %v715_v25, %v715_v25  ;;  %v717_v29 = vpop.eup %716 }
 0x191   : > { %440 = vadd.xlane.f32.xlu1 %v439_v26  ;;  %v438_v31 = vmul.f32 %v717_v29, %v437_v30 }
 0x192   : > { %665 = vmatmul.msk.bf16.vlgmr.msra.gmra.mxu1 %vm379_vm0, %v452_v27 }
 0x1aa   : > { %448 = vperm.xlu1 %712, %v717_v29  }
 0x204   : > { %v441_v32 = vpop.xlane.xlu1 %440 }
 0x205   : > { %v442_v33 = vadd.f32 %v441_v32, %v438_v31 }
 0x207   : > { %444 = vst.msk [vmem:[#allocation3] sm:$0xff] %vm376_vm1, %v442_v33 }
 0x20e   : > { %v481_v34 = vld [vmem:[#allocation3] sm:$0xff] }
 0x20f   : > { %v470_v35 = vpop.f32.mrf.mxu1  ;;  %718 = vrcp.f32 %v481_v34 }
 0x215   : > { %v719_v36 = vpop.eup %718 }
 0x216   : > { %485 = vperm.xlu2 %713, %v719_v36  }
 0x217   : > { %v472_v37 = vpop.f32.mrf.mxu1 }
 0x21c   : > { %v449_v39 = vpop.permute.xlu1 %448 }
 0x21d   : > { %v451_v40 = vmul.f32 %v449_v39, %v445_v38 }
 0x21f   : > { %v474_v41 = vadd.f32 %v470_v35, %v451_v40 }
 0x221   : > { %475 = vst.msk [vmem:[#allocation4] sm:$0xff] %vm379_vm0, %v474_v41 }
 0x228   : > { %v480_v42 = vld [vmem:[#allocation4] sm:$0xff] }
 0x270   : > { %v486_v43 = vpop.permute.xlu2 %485 }
 0x271   : > { %v488_v44 = vmul.f32 %v486_v43, %v480_v42 }
 0x273   : > { %v489_v45 = vpack.c.bf16 %v488_v44, %v488_v44 }
 0x275   : > { %491 = vst.msk [vmem:[%s370_s13] sm:$0xf] %vm490_vm7, %v489_v45 }
 0x276 PF: > { %s14_s19 = sadd.s32 1, %s758_s19   ;;  %s870_s15 = smov %s750_s17 }
 0x277   : > { %p11_p7 = scmp.ge.s32.totalorder %s14_s19, 10   ;;  %s871_s16 = smov %s754_s18 }
 0x278   : > { %s872_s17 = smov %s875_s20  ;;  %s873_s18 = smov %s879_s21 }
 0x279   :  { %13 = sbr.rel (!%p11_p7) target bundleno = 3 (0x3), region = 83 }

// kernel: transformer_forward.35
= control target key start
LH: loop header
LB: loop body
LE: loop exit
PB: predicated region body
PF: predicated region fallthrough
CT: control target
= control target key end

     0   :  { %vm28_vm0 = vcmask 261120   ;;  %v198_v1 = vmov 0.0   ;;  %v199_v22 = vmov 32.0   ;;  %vm160_vm6 = vcmask 257024   ;;  %s271_s1 = inlined_call_operand.vmem [shape: bf16[32,32], index: 1, kind: input, shape index: {}]   ;;  %s272_s0 = inlined_call_operand.vmem [shape: bf16[16,32], index: 0, kind: input, shape index: {}]   ;;  %s273_s2 = inlined_call_operand.vmem [shape: f32[1,32], index: 2, kind: input, shape index: {}]   ;;  %s274_s3 = inlined_call_operand.vmem [shape: bf16[16,32], index: 3, kind: input, shape index: {}]   ;;  %s275_s4 = inlined_call_operand.vmem [shape: f32[1,32], index: 4, kind: input, shape index: {}]   ;;  %s276_s5 = inlined_call_operand.vmem [shape: f32[1,32], index: 5, kind: input, shape index: {}]   ;;  %s277_s6 = inlined_call_operand.vmem [shape: bf16[16,32], index: 6, kind: output, shape index: {}]  }
   0x1   :  { %v182_v0 = vld [vmem:[%s271_s1 + $0x8] sm:$0xff]  ;;  %29 = vst.msk [vmem:[#allocation2] sm:$0xff] %vm28_vm0, %v198_v1  ;;  %v181_v2 = vld [vmem:[%s271_s1] sm:$0xff]  ;;  %192 = vrcp.f32 %v199_v22 }
   0x2   :  { %30 = vst.msk [vmem:[#allocation2 + $0x8] sm:$0xff] %vm28_vm0, %v198_v1  ;;  %66 = vmatpush.bf16.msra.mxu0 %v182_v0  ;;  %v180_v3 = vld [vmem:[%s272_s0] sm:$0xff] }
   0x3   :  { %v184_v8 = vld [vmem:[%s274_s3] sm:$0xff]  }
   0x4   :  { %v189_v9 = vld [vmem:[%s273_s2] ss:$0 sm:$0xff]  ;;  %v185_v12 = vunpack.c.l.bf16 %v184_v8  ;;  %v186_v17 = vunpack.c.h.bf16 %v184_v8 }
   0x5   :  { %v190_v53 = vld [vmem:[%s275_s4] ss:$0 sm:$0xff] }
   0x6   :  { %67 = vmatpush.bf16.msra.mxu0 %v181_v2  ;;  %v191_v56 = vld [vmem:[%s276_s5] ss:$0 sm:$0xff] }
   0x7   :  { %v193_v23 = vpop.eup %192 }
   0x8   :  { %v31_v4 = vld [vmem:[#allocation2] sm:$0xff]  ;;  %v102_v24 = vmul.f32 32.0, %v193_v23  ;;  %vm106_vm1 = vweird.f32 %v193_v23 }
   0x9   :  { %179 = vmatmul.msk.bf16.vlgmr.msra.gmra.mxu0 %vm28_vm0, %v180_v3  ;;  %v32_v7 = vld [vmem:[#allocation2 + $0x8] sm:$0xff] }
   0xa   :  { %v103_v25 = vsub.f32 1.0, %v102_v24 }
   0xc   :  { %v104_v26 = vmul.f32 %v193_v23, %v103_v25 }
   0xe   :  { %v105_v27 = vadd.f32 %v193_v23, %v104_v26 }
  0x10   :  { %v107_v28 = vsel %vm106_vm1, %v193_v23, %v105_v27 }
  0x86   :  { %v69_v5 = vpop.f32.mrf.mxu0 }
  0x87   :  { %v74_v6 = vadd.f32 %v69_v5, %v31_v4 }
  0x89   :  { %76 = vst.msk [vmem:[#allocation2] sm:$0xff] %vm28_vm0, %v74_v6 }
  0x8e   :  { %v71_v10 = vpop.f32.mrf.mxu0 }
  0x8f   :  { %v75_v11 = vadd.f32 %v71_v10, %v32_v7 }
  0x90   :  { %v81_v13 = vld [vmem:[#allocation2] sm:$0xff] }
  0x91   :  { %77 = vst.msk [vmem:[#allocation2 + $0x8] sm:$0xff] %vm28_vm0, %v75_v11  ;;  %v87_v14 = vadd.f32 %v189_v9, %v81_v13 }
  0x93   :  { %v93_v15 = vadd.f32 %v185_v12, %v87_v14 }
  0x95   :  { %v95_v16 = vsel %vm28_vm0, %v93_v15, 0.0 }
  0x96   :  { %96 = vadd.xlane.f32.xlu0 %v95_v16 }
  0x98   :  { %v82_v18 = vld [vmem:[#allocation2 + $0x8] sm:$0xff] }
  0x99   :  { %v88_v19 = vadd.f32 %v189_v9, %v82_v18 }
  0x9b   :  { %v94_v20 = vadd.f32 %v186_v17, %v88_v19 }
  0x9d   :  { %v98_v21 = vsel %vm28_vm0, %v94_v20, 0.0 }
  0x9e   :  { %99 = vadd.xlane.f32.xlu0 %v98_v21 }
 0x109   :  { %v97_v29 = vpop.xlane.xlu0 %96 }
 0x10a   :  { %v108_v30 = vmul.f32 %v107_v28, %v97_v29 }
 0x10c   :  { %v110_v31 = vsub.f32 %v93_v15, %v108_v30 }
 0x10e   :  { %v112_v32 = vmul.f32 %v110_v31, %v110_v31 }
 0x110   :  { %v114_v33 = vsel %vm28_vm0, %v112_v32, 0.0 }
 0x111   :  { %115 = vadd.xlane.f32.xlu1 %v114_v33  ;;  %v100_v34 = vpop.xlane.xlu0 %99 }
 0x112   :  { %v109_v35 = vmul.f32 %v107_v28, %v100_v34 }
 0x114   :  { %v111_v36 = vsub.f32 %v94_v20, %v109_v35 }
 0x116   :  { %v113_v37 = vmul.f32 %v111_v36, %v111_v36 }
 0x118   :  { %v117_v38 = vsel %vm28_vm0, %v113_v37, 0.0 }
 0x119   :  { %118 = vadd.xlane.f32.xlu1 %v117_v38 }
 0x184   :  { %v116_v39 = vpop.xlane.xlu1 %115 }
 0x185   :  { %v120_v40 = vmul.f32 %v116_v39, %v107_v28 }
 0x187   :  { %v122_v41 = vadd.f32 1e-05, %v120_v40 }
 0x189   :  { %194 = vrsqrt.f32 %v122_v41  ;;  %vm130_vm3 = vweird.f32 %v122_v41 }
 0x18c   :  { %v119_v42 = vpop.xlane.xlu1 %118 }
 0x18d   :  { %v121_v43 = vmul.f32 %v119_v42, %v107_v28 }
 0x18f   :  { %v195_v44 = vpop.eup %194  ;;  %v123_v45 = vadd.f32 1e-05, %v121_v43 }
 0x190   :  { %v125_v46 = vmul.f32 %v195_v44, %v122_v41  ;;  %vm131_vm2 = vweird.f32 %v195_v44 }
 0x191   :  { %196 = vrsqrt.f32 %v123_v45  ;;  %vm132_vm4 = vmor %vm130_vm3, %vm131_vm2  ;;  %vm140_vm7 = vweird.f32 %v123_v45 }
 0x192   :  { %v126_v47 = vmul.f32 %v195_v44, %v125_v46 }
 0x194   :  { %v127_v48 = vmul.f32 0.5, %v126_v47 }
 0x196   :  { %v128_v49 = vsub.f32 1.5, %v127_v48 }
 0x197   :  { %v197_v50 = vpop.eup %196 }
 0x198   :  { %v129_v51 = vmul.f32 %v195_v44, %v128_v49  ;;  %v135_v52 = vmul.f32 %v197_v50, %v123_v45  ;;  %vm141_vm5 = vweird.f32 %v197_v50 }
 0x199   :  { %vm142_vm8 = vmor %vm140_vm7, %vm141_vm5 }
 0x19a   :  { %v133_v54 = vsel %vm132_vm4, %v195_v44, %v129_v51  ;;  %v136_v55 = vmul.f32 %v197_v50, %v135_v52 }
 0x19b   :  { %v144_v57 = vmul.f32 %v133_v54, %v110_v31 }
 0x19c   :  { %v137_v58 = vmul.f32 0.5, %v136_v55 }
 0x19d   :  { %v150_v59 = vmul.f32 %v190_v53, %v144_v57 }
 0x19e   :  { %v138_v60 = vsub.f32 1.5, %v137_v58 }
 0x19f   :  { %v156_v61 = vadd.f32 %v191_v56, %v150_v59 }
 0x1a0   :  { %v139_v62 = vmul.f32 %v197_v50, %v138_v60 }
 0x1a1   :  { %v158_v63 = vpack.c.bf16 %v156_v61, %v156_v61 }
 0x1a2   :  { %v143_v0 = vsel %vm142_vm8, %v197_v50, %v139_v62 }
 0x1a3   :  { %161 = vst.msk [vmem:[%s277_s6] sm:$0xf] %vm160_vm6, %v158_v63  ;;  %v145_v1 = vmul.f32 %v143_v0, %v111_v36 }
 0x1a5   :  { %v151_v2 = vmul.f32 %v190_v53, %v145_v1 }
 0x1a7   :  { %v157_v3 = vadd.f32 %v191_v56, %v151_v2 }
 0x1a9   :  { %v159_v4 = vpack.c.bf16 %v157_v3, %v157_v3 }
 0x1ab   :  { %162 = vst.msk [vmem:[%s277_s6 + $0x4] sm:$0xf] %vm160_vm6, %v159_v4 }

// kernel: transformer_forward.37
= control target key start
LH: loop header
LB: loop body
LE: loop exit
PB: predicated region body
PF: predicated region fallthrough
CT: control target
= control target key end

     0   :  { %vm19_vm0 = vcmask 523264   ;;  %v108_v1 = vmov 0.0   ;;  %vm47_vm1 = vcmask 261120   ;;  %vm83_vm2 = vcmask 519168   ;;  %s151_s1 = inlined_call_operand.vmem [shape: bf16[32,64], index: 1, kind: input, shape index: {}]   ;;  %s152_s2 = inlined_call_operand.vmem [shape: f32[1,64], index: 2, kind: input, shape index: {}]   ;;  %s153_s0 = inlined_call_operand.vmem [shape: bf16[16,32], index: 0, kind: input, shape index: {}]   ;;  %s154_s3 = inlined_call_operand.vmem [shape: bf16[16,64], index: 3, kind: output, shape index: {}]  }
   0x1   :  { %v105_v0 = vld [vmem:[%s151_s1 + $0x8] sm:$0xff]  ;;  %20 = vst.msk [vmem:[#allocation2] sm:$0xff] %vm19_vm0, %v108_v1  ;;  %v104_v2 = vld [vmem:[%s151_s1] sm:$0xff] }
   0x2   :  { %21 = vst.msk [vmem:[#allocation2 + $0x8] sm:$0xff] %vm19_vm0, %v108_v1  ;;  %57 = vmatpush.bf16.msra.mxu0 %v105_v0  ;;  %v103_v3 = vld [vmem:[%s153_s0] sm:$0xff] }
   0x3   :  { %v107_v8 = vld [vmem:[%s152_s2] ss:$0 sm:$0xff] }
   0x6   :  { %58 = vmatpush.bf16.msra.mxu0 %v104_v2 }
   0x8   :  { %v28_v4 = vld [vmem:[#allocation2] sm:$0xff] }
   0x9   :  { %102 = vmatmul.msk.bf16.vlgmr.msra.gmra.mxu0 %vm47_vm1, %v103_v3  ;;  %v29_v7 = vld [vmem:[#allocation2 + $0x8] sm:$0xff] }
  0x86   :  { %v60_v5 = vpop.f32.mrf.mxu0 }
  0x87   :  { %v65_v6 = vadd.f32 %v60_v5, %v28_v4 }
  0x89   :  { %68 = vst.msk [vmem:[#allocation2] sm:$0xff] %vm19_vm0, %v65_v6 }
  0x8e   :  { %v62_v9 = vpop.f32.mrf.mxu0 }
  0x8f   :  { %v66_v10 = vadd.f32 %v62_v9, %v29_v7 }
  0x90   :  { %v73_v11 = vld [vmem:[#allocation2] sm:$0xff] }
  0x91   :  { %v79_v12 = vadd.f32 %v107_v8, %v73_v11  ;;  %69 = vst.msk [vmem:[#allocation2 + $0x8] sm:$0xff] %vm19_vm0, %v66_v10 }
  0x93   :  { %v81_v13 = vpack.c.bf16 %v79_v12, %v79_v12 }
  0x95   :  { %84 = vst.msk [vmem:[%s154_s3] sm:$0xf] %vm83_vm2, %v81_v13 }
  0x98   :  { %v74_v14 = vld [vmem:[#allocation2 + $0x8] sm:$0xff] }
  0x99   :  { %v80_v15 = vadd.f32 %v107_v8, %v74_v14 }
  0x9b   :  { %v82_v16 = vpack.c.bf16 %v80_v15, %v80_v15 }
  0x9d   :  { %85 = vst.msk [vmem:[%s154_s3 + $0x4] sm:$0xf] %vm83_vm2, %v82_v16 }

// kernel: transformer_forward.49
= control target key start
LH: loop header
LB: loop body
LE: loop exit
PB: predicated region body
PF: predicated region fallthrough
CT: control target
= control target key end

     0   :  { %vm41_vm0 = vcmask 261120   ;;  %vm17_vm1 = vcmask 523264   ;;  %s197_s0 = inlined_call_operand.vmem [shape: bf16[16,32], index: 0, kind: input, shape index: {}]   ;;  %s198_s1 = inlined_call_operand.vmem [shape: f32[64,32], index: 1, kind: input, shape index: {}]   ;;  %s199_s2 = inlined_call_operand.hbm [shape: f32[16,64], index: 2, kind: output, shape index: {}]  }
   0x1   :  { %v28_v0 = vld [vmem:[%s198_s1 + $0x30] sm:$0xff]  ;;  %v29_v1 = vld [vmem:[%s198_s1 + $0x38] sm:$0xff]  ;;  %v26_v3 = vld [vmem:[%s198_s1 + $0x20] sm:$0xff] }
   0x2   :  { %v33_v2 = vpack.c.bf16 %v29_v1, %v28_v0  ;;  %v27_v4 = vld [vmem:[%s198_s1 + $0x28] sm:$0xff] }
   0x4   :  { %v55_v5 = vsel %vm41_vm0, %v33_v2, 0 }
   0x5   :  { %7 = vsyncpa [#allocation4], 0  ;;  %61 = vmatpush.bf16.xpose.msra.mxu0 %v55_v5  ;;  %v137_v6 = vmov 0.0   ;;  %v32_v7 = vpack.c.bf16 %v27_v4, %v26_v3  ;;  %v24_v9 = vld [vmem:[%s198_s1 + $0x10] sm:$0xff]  ;;  %v25_v10 = vld [vmem:[%s198_s1 + $0x18] sm:$0xff]  ;;  %s139_s30 = smov 128  }
   0x6   :  { %18 = vst.msk [vmem:[#allocation2] sm:$0xff] %vm17_vm1, %v137_v6  ;;  %v31_v11 = vpack.c.bf16 %v25_v10, %v24_v9  ;;  %v22_v13 = vld [vmem:[%s198_s1] sm:$0xff]  ;;  %v23_v14 = vld [vmem:[%s198_s1 + $0x8] sm:$0xff]  ;;  %s138_s1 = smov [#allocation3]   ;;  %s140_s3 = smov 8  }
   0x7   :  { %19 = vst.msk [vmem:[#allocation2 + $0x8] sm:$0xff] %vm17_vm1, %v137_v6  ;;  %v52_v8 = vsel %vm41_vm0, %v32_v7, 0  ;;  %v30_v15 = vpack.c.bf16 %v23_v14, %v22_v13  ;;  %v106_v17 = vld [vmem:[%s197_s0] sm:$0xff]  ;;  %s87_s27 = sshll.u32 %s138_s1, 4  ;;  %s89_s0 = sshll.u32 %s199_s2, 4  ;;  %s88_s27 = int_to_ptr.vmem [resolvable:$true] %s87_s27  ;;  %s90_s0 = int_to_ptr.hbm [resolvable:$true] %s89_s0 }
   0x8   :  { %v49_v12 = vsel %vm41_vm0, %v31_v11, 0 }
   0x9   :  { %v46_v16 = vsel %vm41_vm0, %v30_v15, 0 }
   0xd   :  { %62 = vmatpush.bf16.xpose.msra.mxu0 %v52_v8  ;;  %v34_v18 = vld [vmem:[#allocation2] sm:$0xff] }
   0xe   :  { %v35_v21 = vld [vmem:[#allocation2 + $0x8] sm:$0xff] }
  0x15   :  { %63 = vmatpush.bf16.xpose.msra.mxu0 %v49_v12 }
  0x1d   :  { %64 = vmatpush.bf16.xpose.msra.mxu0 %v46_v16 }
  0x24   :  { %105 = vmatmul.msk.bf16.vlgmr.msra.gmra.mxu0 %vm41_vm0, %v106_v17 }
  0xa1   :  { %v66_v19 = vpop.f32.mrf.mxu0 }
  0xa2   :  { %v71_v20 = vadd.f32 %v66_v19, %v34_v18 }
  0xa4   :  { %74 = vst.msk [vmem:[#allocation2] sm:$0xff] %vm17_vm1, %v71_v20 }
  0xa9   :  { %v68_v22 = vpop.f32.mrf.mxu0 }
  0xaa   :  { %v72_v23 = vadd.f32 %v68_v22, %v35_v21 }
  0xab   :  { %v79_v24 = vld [vmem:[#allocation2] sm:$0xff] }
  0xac   :  { %75 = vst.msk [vmem:[#allocation2 + $0x8] sm:$0xff] %vm17_vm1, %v72_v23 }
  0xad   :  { %81 = vst.msk [vmem:[#allocation3] sm:$0xff] %vm17_vm1, %v79_v24 }
  0xb3   :  { %v80_v25 = vld [vmem:[#allocation2 + $0x8] sm:$0xff] }
  0xb4   :  { %82 = vst.msk [vmem:[#allocation3 + $0x8] sm:$0xff] %vm17_vm1, %v80_v25 }
  0xb5   :  { %95 = dma.vmem_to_hbm [thread:$0]  %s88_s27, 256, %s90_s0, [#allocation4], %s139_s30, %s139_s30, %s140_s3  }
  0xb6   :  { %135 = dma.done.wait [#allocation4], 256  }
  0xb7   :  { %136 = vsyncadd [#allocation4], 4294967040 }
  0xb8   :  { %100 = vsyncpa [#allocation4], 1 }

// kernel: transformer_forward.28
= control target key start
LH: loop header
LB: loop body
LE: loop exit
PB: predicated region body
PF: predicated region fallthrough
CT: control target
= control target key end

     0   :  { %vm31_vm0 = vcmask 261120   ;;  %v274_v7 = vmov 0.0   ;;  %vm116_vm1 = vcmask 523264   ;;  %v275_v34 = vmov 32.0   ;;  %s367_s1 = inlined_call_operand.vmem [shape: bf16[32,64], index: 1, kind: input, shape index: {}]   ;;  %s368_s2 = inlined_call_operand.vmem [shape: f32[1,64], index: 2, kind: input, shape index: {}]   ;;  %s369_s0 = inlined_call_operand.vmem [shape: bf16[16,32], index: 0, kind: input, shape index: {}]   ;;  %s370_s3 = inlined_call_operand.vmem [shape: bf16[64,32], index: 3, kind: input, shape index: {}]   ;;  %s371_s4 = inlined_call_operand.vmem [shape: f32[1,32], index: 4, kind: input, shape index: {}]   ;;  %s372_s5 = inlined_call_operand.vmem [shape: f32[1,32], index: 5, kind: input, shape index: {}]   ;;  %s373_s6 = inlined_call_operand.vmem [shape: f32[1,32], index: 6, kind: input, shape index: {}]   ;;  %s374_s7 = inlined_call_operand.vmem [shape: bf16[16,32], index: 7, kind: output, shape index: {}]  }
   0x1   :  { %v257_v0 = vld [vmem:[%s367_s1 + $0x8] sm:$0xff]  ;;  %v256_v1 = vld [vmem:[%s367_s1] sm:$0xff]  ;;  %v261_v3 = vld [vmem:[%s370_s3 + $0x18] sm:$0xff]  ;;  %32 = vst.msk [vmem:[#allocation2] sm:$0xff] %vm31_vm0, %v274_v7  ;;  %268 = vrcp.f32 %v275_v34  ;;  %vm218_vm7 = vcmask 257024  }
   0x2   :  { %71 = vmatpush.bf16.msra.mxu0 %v257_v0  ;;  %v255_v2 = vld [vmem:[%s369_s0] sm:$0xff]  ;;  %124 = vmatpush.bf16.msra.mxu1 %v261_v3  ;;  %v260_v4 = vld [vmem:[%s370_s3 + $0x10] sm:$0xff]  ;;  %v259_v5 = vld [vmem:[%s370_s3 + $0x8] sm:$0xff]  ;;  %33 = vst.msk [vmem:[#allocation2 + $0x8] sm:$0xff] %vm31_vm0, %v274_v7 }
   0x3   :  { %v258_v6 = vld [vmem:[%s370_s3] sm:$0xff] }
   0x4   :  { %v264_v9 = vld [vmem:[%s368_s2] ss:$0 sm:$0xff] }
   0x5   :  { %v34_v20 = vld [vmem:[%s369_s0] sm:$0xff]  }
   0x6   :  { %72 = vmatpush.bf16.msra.mxu0 %v256_v1  ;;  %125 = vmatpush.bf16.msra.mxu1 %v260_v4  ;;  %v265_v21 = vld [vmem:[%s371_s4] ss:$0 sm:$0xff]  ;;  %v149_v24 = vunpack.c.l.bf16 %v34_v20  ;;  %v150_v29 = vunpack.c.h.bf16 %v34_v20 }
   0x7   :  { %v269_v35 = vpop.eup %268  ;;  %v266_v1 = vld [vmem:[%s372_s5] ss:$0 sm:$0xff] }
   0x8   :  { %v81_v16 = vld [vmem:[#allocation2] sm:$0xff]  ;;  %v160_v36 = vmul.f32 32.0, %v269_v35  ;;  %vm164_vm2 = vweird.f32 %v269_v35 }
   0x9   :  { %237 = vmatmul.msk.bf16.vlgmr.msra.gmra.mxu0 %vm31_vm0, %v255_v2  ;;  %v82_v19 = vld [vmem:[#allocation2 + $0x8] sm:$0xff]  ;;  %v267_v4 = vld [vmem:[%s373_s6] ss:$0 sm:$0xff] }
   0xa   :  { %126 = vmatpush.bf16.msra.mxu1 %v259_v5  ;;  %v161_v37 = vsub.f32 1.0, %v160_v36 }
   0xc   :  { %v162_v38 = vmul.f32 %v269_v35, %v161_v37 }
   0xe   :  { %127 = vmatpush.bf16.msra.mxu1 %v258_v6  ;;  %v163_v39 = vadd.f32 %v269_v35, %v162_v38 }
  0x10   :  { %v165_v40 = vsel %vm164_vm2, %v269_v35, %v163_v39 }
  0x86   :  { %v74_v8 = vpop.f32.mrf.mxu0 }
  0x87   :  { %v75_v10 = vadd.f32 %v264_v9, %v74_v8 }
  0x89   :  { %v79_v13 = vmax.f32 %v75_v10, 0.0 }
  0x8e   :  { %v76_v11 = vpop.f32.mrf.mxu0 }
  0x8f   :  { %v77_v12 = vadd.f32 %v264_v9, %v76_v11 }
  0x91   :  { %v80_v14 = vmax.f32 %v77_v12, 0.0 }
  0x93   :  { %v83_v15 = vpack.c.bf16 %v80_v14, %v79_v13 }
  0x95   :  { %254 = vmatmul.msk.bf16.vlgmr.msra.gmra.mxu1 %vm116_vm1, %v83_v15 }
 0x112   :  { %v129_v17 = vpop.f32.mrf.mxu1 }
 0x113   :  { %v134_v18 = vadd.f32 %v129_v17, %v81_v16 }
 0x115   :  { %136 = vst.msk [vmem:[#allocation2] sm:$0xff] %vm31_vm0, %v134_v18 }
 0x11a   :  { %v131_v22 = vpop.f32.mrf.mxu1 }
 0x11b   :  { %v135_v23 = vadd.f32 %v131_v22, %v82_v19 }
 0x11c   :  { %v141_v25 = vld [vmem:[#allocation2] sm:$0xff] }
 0x11d   :  { %137 = vst.msk [vmem:[#allocation2 + $0x8] sm:$0xff] %vm31_vm0, %v135_v23  ;;  %v147_v26 = vadd.f32 %v265_v21, %v141_v25 }
 0x11f   :  { %v151_v27 = vadd.f32 %v149_v24, %v147_v26 }
 0x121   :  { %v153_v28 = vsel %vm31_vm0, %v151_v27, 0.0 }
 0x122   :  { %154 = vadd.xlane.f32.xlu0 %v153_v28 }
 0x124   :  { %v142_v30 = vld [vmem:[#allocation2 + $0x8] sm:$0xff] }
 0x125   :  { %v148_v31 = vadd.f32 %v265_v21, %v142_v30 }
 0x127   :  { %v152_v32 = vadd.f32 %v150_v29, %v148_v31 }
 0x129   :  { %v156_v33 = vsel %vm31_vm0, %v152_v32, 0.0 }
 0x12a   :  { %157 = vadd.xlane.f32.xlu0 %v156_v33 }
 0x195   :  { %v155_v41 = vpop.xlane.xlu0 %154 }
 0x196   :  { %v166_v42 = vmul.f32 %v165_v40, %v155_v41 }
 0x198   :  { %v168_v43 = vsub.f32 %v151_v27, %v166_v42 }
 0x19a   :  { %v170_v44 = vmul.f32 %v168_v43, %v168_v43 }
 0x19c   :  { %v172_v45 = vsel %vm31_vm0, %v170_v44, 0.0 }
 0x19d   :  { %173 = vadd.xlane.f32.xlu1 %v172_v45  ;;  %v158_v46 = vpop.xlane.xlu0 %157 }
 0x19e   :  { %v167_v47 = vmul.f32 %v165_v40, %v158_v46 }
 0x1a0   :  { %v169_v48 = vsub.f32 %v152_v32, %v167_v47 }
 0x1a2   :  { %v171_v49 = vmul.f32 %v169_v48, %v169_v48 }
 0x1a4   :  { %v175_v50 = vsel %vm31_vm0, %v171_v49, 0.0 }
 0x1a5   :  { %176 = vadd.xlane.f32.xlu1 %v175_v50 }
 0x210   :  { %v174_v51 = vpop.xlane.xlu1 %173 }
 0x211   :  { %v178_v52 = vmul.f32 %v174_v51, %v165_v40 }
 0x213   :  { %v180_v53 = vadd.f32 1e-05, %v178_v52 }
 0x215   :  { %270 = vrsqrt.f32 %v180_v53  ;;  %vm188_vm4 = vweird.f32 %v180_v53 }
 0x218   :  { %v177_v54 = vpop.xlane.xlu1 %176 }
 0x219   :  { %v179_v55 = vmul.f32 %v177_v54, %v165_v40 }
 0x21b   :  { %v271_v56 = vpop.eup %270  ;;  %v181_v57 = vadd.f32 1e-05, %v179_v55 }
 0x21c   :  { %v183_v58 = vmul.f32 %v271_v56, %v180_v53  ;;  %vm189_vm3 = vweird.f32 %v271_v56 }
 0x21d   :  { %272 = vrsqrt.f32 %v181_v57  ;;  %vm190_vm5 = vmor %vm188_vm4, %vm189_vm3  ;;  %vm198_vm8 = vweird.f32 %v181_v57 }
 0x21e   :  { %v184_v59 = vmul.f32 %v271_v56, %v183_v58 }
 0x220   :  { %v185_v60 = vmul.f32 0.5, %v184_v59 }
 0x222   :  { %v186_v61 = vsub.f32 1.5, %v185_v60 }
 0x223   :  { %v273_v62 = vpop.eup %272 }
 0x224   :  { %v187_v63 = vmul.f32 %v271_v56, %v186_v61  ;;  %v193_v0 = vmul.f32 %v273_v62, %v181_v57  ;;  %vm199_vm6 = vweird.f32 %v273_v62 }
 0x225   :  { %vm200_vm9 = vmor %vm198_vm8, %vm199_vm6 }
 0x226   :  { %v191_v2 = vsel %vm190_vm5, %v271_v56, %v187_v63  ;;  %v194_v3 = vmul.f32 %v273_v62, %v193_v0 }
 0x227   :  { %v202_v5 = vmul.f32 %v191_v2, %v168_v43 }
 0x228   :  { %v195_v6 = vmul.f32 0.5, %v194_v3 }
 0x229   :  { %v208_v7 = vmul.f32 %v266_v1, %v202_v5 }
 0x22a   :  { %v196_v8 = vsub.f32 1.5, %v195_v6 }
 0x22b   :  { %v214_v9 = vadd.f32 %v267_v4, %v208_v7 }
 0x22c   :  { %v197_v10 = vmul.f32 %v273_v62, %v196_v8 }
 0x22d   :  { %v216_v11 = vpack.c.bf16 %v214_v9, %v214_v9 }
 0x22e   :  { %v201_v12 = vsel %vm200_vm9, %v273_v62, %v197_v10 }
 0x22f   :  { %219 = vst.msk [vmem:[%s374_s7] sm:$0xf] %vm218_vm7, %v216_v11  ;;  %v203_v13 = vmul.f32 %v201_v12, %v169_v48 }
 0x231   :  { %v209_v14 = vmul.f32 %v266_v1, %v203_v13 }
 0x233   :  { %v215_v15 = vadd.f32 %v267_v4, %v209_v14 }
 0x235   :  { %v217_v16 = vpack.c.bf16 %v215_v15, %v215_v15 }
 0x237   :  { %220 = vst.msk [vmem:[%s374_s7 + $0x4] sm:$0xf] %vm218_vm7, %v217_v16 }

// kernel: transformer_forward.26
= control target key start
LH: loop header
LB: loop body
LE: loop exit
PB: predicated region body
PF: predicated region fallthrough
CT: control target
= control target key end

     0   :  { %s776_s15 = smov 0   ;;  %s778_s16 = smov 0   ;;  %s853_s0 = inlined_call_operand.vmem [shape: f32[2,1,8], index: 0, kind: input, shape index: {}]   ;;  %s854_s1 = inlined_call_operand.vmem [shape: bf16[2,4,8,8], index: 1, kind: input, shape index: {}]   ;;  %s855_s2 = inlined_call_operand.vmem [shape: bf16[2,4,8,8], index: 2, kind: input, shape index: {}]   ;;  %s856_s3 = inlined_call_operand.vmem [shape: bf16[2,4,8,8], index: 3, kind: input, shape index: {}]   ;;  %s857_s4 = inlined_call_operand.vmem [shape: bf16[2,4,8,8], index: 4, kind: output, shape index: {}]  }
   0x1   :  { %s780_s17 = smov 0   ;;  %s782_s18 = smov 0  }
   0x2   :  { %s784_s19 = smov 0  }
   0x3 LB: > { %s36_s20 = sadd.s32 1, %s738_s17  ;;  %s40_s21 = sadd.s32 1, %s742_s18  ;;  %s746_s19 = sphi %s784_s19, %s14_s19   ;;  %s742_s18 = sphi %s782_s18, %s861_s18   ;;  %s738_s17 = sphi %s780_s17, %s860_s17   ;;  %s734_s16 = sphi %s778_s16, %s859_s16   ;;  %s730_s15 = sphi %s776_s15, %s858_s15  }
   0x4   : > { %p38_p0 = scmp.ge.s32.totalorder %s36_s20, 4  ;;  %p643_p1 = scmp.ge.s32.totalorder %s746_s19, 1 }
   0x5   : > { %p255_p2 = scmp.lt.s32.totalorder %s746_s19, 9 }
   0x6   : > { %s863_s20 = smov (%p38_p0, %s36_s20), 0  ;;  %s865_s21 = smov (!%p38_p0, %s40_s21), %s742_s18 }
   0x7   : > { %p256_p3 = pnand %p643_p1, %p255_p2  ;;  %p42_p4 = scmp.ge.s32.totalorder %s865_s21, 2 }
   0x8   : > { %p321_p5 = scmp.lt.s32.totalorder (!%p256_p3), %s734_s16, 1  ;;  %p329_p6 = scmp.lt.s32.totalorder (!%p256_p3), %s730_s15, 3 }
   0x9   : > { %s867_s21 = smov (%p42_p4, %s865_s21), 0  ;;  %259 = sbr.rel (%p256_p3) target bundleno = 630 (0x276), region = 36 }
   0xe   : > { %s869_s16 = smov (!%p321_p5, %s734_s16), 1  ;;  %s871_s15 = smov (!%p329_p6, %s730_s15), 3  ;;  %vm379_vm0 = vcmask 64512   ;;  %v748_v3 = vmov 0   ;;  %vm376_vm1 = vcmask 7168   ;;  %v750_v12 = vmov 0.0  }
   0xf   : > { %s644_s22 = sshll.u32 %s869_s16, 2  ;;  %699 = vset.pattern.permute.xlu0 %v748_v3  ;;  %700 = vset.pattern.permute.xlu1 %v748_v3  ;;  %v749_v4 = vmov -1e+30   ;;  %s326_s7 = scalar_lea.vmem %s853_s0, %s869_s16  ;;  %378 = vst.msk [vmem:[#allocation3] sm:$0xff] %vm376_vm1, %v750_v12  ;;  %vm445_vm4 = vcmask 1043456   ;;  %vm478_vm5 = vcmask 60416  }
  0x10   : > { %s335_s23 = sadd.s32 %s644_s22, %s871_s15  ;;  %701 = vset.pattern.permute.xlu2 %v748_v3  ;;  %377 = vst.msk [vmem:[#allocation2] sm:$0xff] %vm376_vm1, %v749_v4  ;;  %v403_v5 = vld [vmem:[%s326_s7] sm:$0x1] }
  0x11   : > { %s806_s24 = sshll.u32 %s335_s23, 2  ;;  %vm404_vm2 = vcmp.gt.f32.partialorder %v403_v5, 0.5  ;;  %380 = vst.msk [vmem:[#allocation4] sm:$0xff] %vm379_vm0, %v750_v12 }
  0x12   : > { %s348_s27 = scalar_lea.vmem %s855_s2, %s806_s24  ;;  %s337_s30 = scalar_lea.vmem %s854_s1, %s806_s24  ;;  %v405_v6 = vsel %vm404_vm2, 1, %v748_v3 }
  0x13   : > { %v382_v0 = vld [vmem:[%s348_s27] sm:$0xf]  ;;  %v406_v7 = vperm.slane %v405_v6, 0  ;;  %s359_s10 = scalar_lea.vmem %s856_s3, %s806_s24  ;;  %s370_s13 = scalar_lea.vmem %s857_s4, %s806_s24 }
  0x14   : > { %v388_v1 = vsel %vm379_vm0, %v382_v0, 0  ;;  %v381_v2 = vld [vmem:[%s337_s30] sm:$0xf] }
  0x15   : > { %397 = vmatpush.bf16.xpose.msra.mxu0 %v388_v1  ;;  %vm407_vm3 = vcmp.eq.s32.totalorder %v406_v7, 1  ;;  %v441_v17 = vld [vmem:[%s359_s10] sm:$0xf] }
  0x16   : > { %v447_v18 = vsel %vm445_vm4, %v441_v17, 0  ;;  %v425_v27 = vld [vmem:[#allocation3] sm:$0xff] }
  0x17   : > { %v409_v13 = vld [vmem:[#allocation2] sm:$0xff]  ;;  %456 = vmatpush.bf16.msra.mxu1 %v447_v18 }
  0x18   : > { %v433_v35 = vld [vmem:[#allocation4] sm:$0xff] }
  0x1c   : > { %652 = vmatmul.msk.bf16.vlgmr.msra.gmra.mxu0 %vm379_vm0, %v381_v2 }
  0x99   : > { %v399_v8 = vpop.f32.mrf.mxu0 }
  0x9a   : > { %v408_v9 = vsel %vm407_vm3, %v399_v8, -1e+09 }
  0x9b   : > { %v410_v10 = vsel %vm379_vm0, %v408_v9, -inf }
  0x9c   : > { %411 = vmax.xlane.f32.xlu0 %v410_v10 }
  0xa1   : > { %v401_v11 = vpop.f32.mrf.mxu0 }
 0x10f   : > { %v412_v14 = vpop.xlane.xlu0 %411 }
 0x110   : > { %v413_v15 = vmax.f32 %v409_v13, %v412_v14 }
 0x112   : > { %v414_v16 = vsub.f32 %v409_v13, %v413_v15  ;;  %464 = vst.msk [vmem:[#allocation2] sm:$0xff] %vm376_vm1, %v413_v15  ;;  %419 = vperm.xlu0 %699, %v413_v15  }
 0x114   : > { %v415_v25 = vmul.f32 1.442695, %v414_v16 }
 0x184   : > { %v420_v19 = vpop.permute.xlu0 %419 }
 0x185   : > { %v422_v20 = vsub.f32 %v408_v9, %v420_v19 }
 0x187   : > { %v423_v21 = vmul.f32 1.442695, %v422_v20 }
 0x189   : > { %702 = vpow2.f32 %v423_v21 }
 0x18a   : > { %704 = vpow2.f32 %v415_v25 }
 0x18f   : > { %v703_v22 = vpop.eup %702 }
 0x190   : > { %v427_v23 = vsel %vm379_vm0, %v703_v22, 0.0  ;;  %v440_v24 = vpack.c.bf16 %v703_v22, %v703_v22  ;;  %v705_v26 = vpop.eup %704 }
 0x191   : > { %428 = vadd.xlane.f32.xlu1 %v427_v23  ;;  %v426_v28 = vmul.f32 %v705_v26, %v425_v27 }
 0x192   : > { %653 = vmatmul.msk.bf16.vlgmr.msra.gmra.mxu1 %vm379_vm0, %v440_v24 }
 0x1aa   : > { %436 = vperm.xlu1 %700, %v705_v26  }
 0x204   : > { %v429_v29 = vpop.xlane.xlu1 %428 }
 0x205   : > { %v430_v30 = vadd.f32 %v429_v29, %v426_v28 }
 0x207   : > { %432 = vst.msk [vmem:[#allocation3] sm:$0xff] %vm376_vm1, %v430_v30 }
 0x20e   : > { %v469_v31 = vld [vmem:[#allocation3] sm:$0xff] }
 0x20f   : > { %v458_v32 = vpop.f32.mrf.mxu1  ;;  %706 = vrcp.f32 %v469_v31 }
 0x215   : > { %v707_v33 = vpop.eup %706 }
 0x216   : > { %473 = vperm.xlu2 %701, %v707_v33  }
 0x217   : > { %v460_v34 = vpop.f32.mrf.mxu1 }
 0x21c   : > { %v437_v36 = vpop.permute.xlu1 %436 }
 0x21d   : > { %v439_v37 = vmul.f32 %v437_v36, %v433_v35 }
 0x21f   : > { %v462_v38 = vadd.f32 %v458_v32, %v439_v37 }
 0x221   : > { %463 = vst.msk [vmem:[#allocation4] sm:$0xff] %vm379_vm0, %v462_v38 }
 0x228   : > { %v468_v39 = vld [vmem:[#allocation4] sm:$0xff] }
 0x270   : > { %v474_v40 = vpop.permute.xlu2 %473 }
 0x271   : > { %v476_v41 = vmul.f32 %v474_v40, %v468_v39 }
 0x273   : > { %v477_v42 = vpack.c.bf16 %v476_v41, %v476_v41 }
 0x275   : > { %479 = vst.msk [vmem:[%s370_s13] sm:$0xf] %vm478_vm5, %v477_v42 }
 0x276 PF: > { %s14_s19 = sadd.s32 1, %s746_s19   ;;  %s858_s15 = smov %s738_s17 }
 0x277   : > { %p11_p7 = scmp.ge.s32.totalorder %s14_s19, 10   ;;  %s859_s16 = smov %s742_s18 }
 0x278   : > { %s860_s17 = smov %s863_s20  ;;  %s861_s18 = smov %s867_s21 }
 0x279   :  { %13 = sbr.rel (!%p11_p7) target bundleno = 3 (0x3), region = 83 }

</bundles_post_ra>
